<compile_context>
chip_gen: v5e
topology: v5e:2x2
jax: 0.10.0
libtpu: 0.0.40
codegen_flags: <defaults>
</compile_context>

<pallas_src>
import functools
import math

import jax
import jax.numpy as jnp
from jax import lax
from jax.experimental import pallas as pl
from jax.experimental.pallas import tpu as pltpu


def _round_up(x, m):
    return ((x + m - 1) // m) * m


def _cparams(dims):
    return pltpu.CompilerParams(
        dimension_semantics=dims,
        vmem_limit_bytes=32 * 1024 * 1024,
    )


def _proxdiv(p, s, dual, lamda, eps):
    if lamda is None:                                  # balanced
        return p / s
    return (p / s) ** (lamda / (lamda + eps)) * jnp.exp(dual / (lamda + eps))


# ---------------------------------------------------------------------------
# Fused single-call path: C, the whole Sinkhorn loop and the dual objective
# live inside one pallas_call (used when Np*Mp*4 bytes is small).
# ---------------------------------------------------------------------------
def _fused_kernel(x_ref, y_ref, x2_ref, y2_ref, xw_ref, yw_ref, lxw_ref,
                  lyw_ref, mn_ref, mm_ref, fcts_ref, gcts_ref, colm_ref,
                  *, eps, logZ, c_scale, n_iter, atol, rtol, thresh,
                  lamda1, lamda2):
    inv_eps = 1.0 / eps
    x = x_ref[...]                       # (Np, D)
    y = y_ref[...]                       # (Mp, D)
    xw = xw_ref[...]                     # (Np, 1)
    yw = yw_ref[...]                     # (1, Mp)
    lxw = lxw_ref[...]                   # (Np, 1)  log(x_w), -inf on padding
    lyw = lyw_ref[...]                   # (1, Mp)
    mn = mn_ref[...]                     # (Np, 1)  1.0/0.0 row mask
    mm = mm_ref[...]                     # (1, Mp)  1.0/0.0 col mask

    # C/eps recomputed once and kept resident in VMEM (compiler-managed).
    # NOTE: default matmul precision (known-good lowering); D is tiny.
    xy = lax.dot_general(x, y, (((1,), (1,)), ((), ())),
                         preferred_element_type=jnp.float32)
    c_eps = jnp.maximum(x2_ref[...] + y2_ref[...] - 2.0 * xy, 0.0) * c_scale

    yw_inf = jnp.max(jnp.abs(yw) * mm, axis=1, keepdims=True)       # (1, 1)

    ones_u = jnp.ones_like(xw)
    ones_v = jnp.ones_like(yw)
    zeros_a = jnp.zeros_like(xw)
    zeros_b = jnp.zeros_like(yw)
    balanced = (lamda1 is None) and (lamda2 is None)

    e0 = jnp.exp(-c_eps - logZ)
    s0 = jnp.sum(e0 * xw, axis=0, keepdims=True) * yw               # K^T 1

    def body(_, carry):
        done, u_prev, u, v, a, b, s = carry
        active = done == 0                                           # (1, 1)

        safe_s = jnp.where(mm > 0, s, 1.0)
        v_new = jnp.where(mm > 0, _proxdiv(yw, safe_s, b, lamda1, eps), 1.0)

        e = jnp.exp(-(c_eps + a * inv_eps + b * inv_eps) - logZ)
        r = jnp.sum(e * (yw * v_new), axis=1, keepdims=True) * xw    # K v
        safe_r = jnp.where(mn > 0, r, 1.0)
        u_new = jnp.where(mn > 0, _proxdiv(xw, safe_r, a, lamda2, eps), 1.0)
        s_new = jnp.sum(e * (xw * u_new), axis=0, keepdims=True) * yw  # K^T u

        if balanced:
            err = jnp.max(jnp.abs(v_new * s_new - yw) * mm, axis=1,
                          keepdims=True)
            conv = jnp.logical_or(err < atol, err < rtol * yw_inf)
        else:
            # TODO(synk): PyTorch aliases u_prev to u (in-place copy_), making
            # its check degenerate; intended non-aliased check implemented.
            err = jnp.max(jnp.abs(u_new - u_prev) * mn, axis=0, keepdims=True)
            u_inf = jnp.max(jnp.abs(u_new) * mn, axis=0, keepdims=True)
            conv = jnp.logical_or(err < atol, err < rtol * u_inf)

        u_inf2 = jnp.max(jnp.abs(u_new) * mn, axis=0, keepdims=True)
        v_inf2 = jnp.max(jnp.abs(v_new) * mm, axis=1, keepdims=True)
        absorb = jnp.logical_and(jnp.maximum(u_inf2, v_inf2) > thresh,
                                 jnp.logical_not(conv))

        a_c = jnp.where(absorb, a - eps * jnp.log(u_new), a)
        b_c = jnp.where(absorb, b - eps * jnp.log(v_new), b)
        # After absorption K' = K * u_i * v_j  =>  K'^T 1 == v * (K^T u).
        s_c = jnp.where(absorb, v_new * s_new, s_new)
        u_c = jnp.where(absorb, ones_u, u_new)
        v_c = jnp.where(absorb, ones_v, v_new)
        done_c = jnp.where(conv, jnp.ones_like(done), done)

        # Freeze the state once converged (static trip count fori_loop).
        return (jnp.where(active, done_c, done),
                jnp.where(active, u_new, u_prev),
                jnp.where(active, u_c, u),
                jnp.where(active, v_c, v),
                jnp.where(active, a_c, a),
                jnp.where(active, b_c, b),
                jnp.where(active, s_c, s))

    init = (jnp.zeros((1, 1), jnp.int32), ones_u, ones_u, ones_v,
            zeros_a, zeros_b, s0)
    _, _, u, v, a, b, _ = lax.fori_loop(0, n_iter, body, init)

    # ---- dual objective pieces --------------------------------------------
    f = -eps * jnp.log(u) + a                  # (Np, 1)
    g = -eps * jnp.log(v) + b                  # (1, Mp)

    def lse(t, axis):
        m = jnp.max(t, axis=axis, keepdims=True)
        m_safe = jnp.where(m == -jnp.inf, 0.0, m)
        return m_safe + jnp.log(jnp.sum(jnp.exp(t - m_safe), axis=axis,
                                        keepdims=True))

    t_rows = -c_eps - g * inv_eps + lyw
    f_cts = eps * lse(t_rows, 1) - eps * logZ                  # (Np, 1)
    t_cols = -c_eps - f * inv_eps + lxw
    g_cts = eps * lse(t_cols, 0) - eps * logZ                  # (1, Mp)

    mass = jnp.exp(-(c_eps + f_cts * inv_eps + g_cts * inv_eps) - logZ)
    col_mass = jnp.sum(mass * xw, axis=0, keepdims=True)       # (1, Mp)

    fcts_ref[...] = f_cts
    gcts_ref[...] = g_cts
    colm_ref[...] = col_mass


def _build_fused_fn(Np, Mp, D, *, eps, logZ, c_scale, n_iter, atol, rtol,
                    thresh, lamda1, lamda2):
    kernel = functools.partial(
        _fused_kernel, eps=eps, logZ=logZ, c_scale=c_scale, n_iter=n_iter,
        atol=atol, rtol=rtol, thresh=thresh, lamda1=lamda1, lamda2=lamda2)

    def full(shape):
        return pl.BlockSpec(shape, lambda i: (0,) * len(shape))

    return pl.pallas_call(
        kernel,
        out_shape=(jax.ShapeDtypeStruct((Np, 1), jnp.float32),
                   jax.ShapeDtypeStruct((1, Mp), jnp.float32),
                   jax.ShapeDtypeStruct((1, Mp), jnp.float32)),
        grid=(1,),
        in_specs=[full((Np, D)), full((Mp, D)), full((Np, 1)), full((1, Mp)),
                  full((Np, 1)), full((1, Mp)), full((Np, 1)), full((1, Mp)),
                  full((Np, 1)), full((1, Mp))],
        out_specs=(full((Np, 1)), full((1, Mp)), full((1, Mp))),
        compiler_params=_cparams(("arbitrary",)),
    )


# ---------------------------------------------------------------------------
# Streaming (tiled) path: C is recomputed per tile from x/y, never stored.
# ---------------------------------------------------------------------------
def _tile_c_eps(x_ref, y_ref, x2_ref, y2_ref, c_scale):
    xy = lax.dot_general(x_ref[...], y_ref[...], (((1,), (1,)), ((), ())),
                         preferred_element_type=jnp.float32)
    return jnp.maximum(x2_ref[...] + y2_ref[...] - 2.0 * xy, 0.0) * c_scale


# s_j = yw_j * sum_i exp(-(C+a_i+b_j)/eps - logZ) * (xw*u)_i   (reduce over N)
def _ktu_kernel(x_ref, y_ref, x2_ref, y2_ref, a_ref, b_ref, row_ref, yw_ref,
                o_ref, *, c_scale, inv_eps, logZ):
    @pl.when(pl.program_id(1) == 0)
    def _init():
        o_ref[...] = jnp.zeros(o_ref.shape, o_ref.dtype)

    c_eps = _tile_c_eps(x_ref, y_ref, x2_ref, y2_ref, c_scale)
    e = jnp.exp(-(c_eps + a_ref[...] * inv_eps + b_ref[...] * inv_eps) - logZ)
    o_ref[...] += jnp.sum(e * row_ref[...], axis=0, keepdims=True) * yw_ref[...]


def _build_ktu_fn(Np, Mp, D, TN, TM, c_scale, inv_eps, logZ):
    kernel = functools.partial(_ktu_kernel, c_scale=c_scale, inv_eps=inv_eps,
                               logZ=logZ)
    return pl.pallas_call(
        kernel,
        out_shape=jax.ShapeDtypeStruct((1, Mp), jnp.float32),
        grid=(Mp // TM, Np // TN),
        in_specs=[
            pl.BlockSpec((TN, D), lambda j, i: (i, 0)),     # x
            pl.BlockSpec((TM, D), lambda j, i: (j, 0)),     # y
            pl.BlockSpec((TN, 1), lambda j, i: (i, 0)),     # ||x||^2
            pl.BlockSpec((1, TM), lambda j, i: (0, j)),     # ||y||^2
            pl.BlockSpec((TN, 1), lambda j, i: (i, 0)),     # a
            pl.BlockSpec((1, TM), lambda j, i: (0, j)),     # b
            pl.BlockSpec((TN, 1), lambda j, i: (i, 0)),     # x_w * u
            pl.BlockSpec((1, TM), lambda j, i: (0, j)),     # y_w
        ],
        out_specs=pl.BlockSpec((1, TM), lambda j, i: (0, j)),
        compiler_params=_cparams(("parallel", "arbitrary")),
    )


# r_i = xw_i * sum_j exp(-(C+a_i+b_j)/eps - logZ) * (yw*v)_j   (reduce over M)
def _kv_kernel(x_ref, y_ref, x2_ref, y2_ref, a_ref, b_ref, col_ref, xw_ref,
               o_ref, *, c_scale, inv_eps, logZ):
    @pl.when(pl.program_id(1) == 0)
    def _init():
        o_ref[...] = jnp.zeros(o_ref.shape, o_ref.dtype)

    c_eps = _tile_c_eps(x_ref, y_ref, x2_ref, y2_ref, c_scale)
    e = jnp.exp(-(c_eps + a_ref[...] * inv_eps + b_ref[...] * inv_eps) - logZ)
    o_ref[...] += jnp.sum(e * col_ref[...], axis=1, keepdims=True) * xw_ref[...]


def _build_kv_fn(Np, Mp, D, TN, TM, c_scale, inv_eps, logZ):
    kernel = functools.partial(_kv_kernel, c_scale=c_scale, inv_eps=inv_eps,
                               logZ=logZ)
    return pl.pallas_call(
        kernel,
        out_shape=jax.ShapeDtypeStruct((Np, 1), jnp.float32),
        grid=(Np // TN, Mp // TM),
        in_specs=[
            pl.BlockSpec((TN, D), lambda i, j: (i, 0)),
            pl.BlockSpec((TM, D), lambda i, j: (j, 0)),
            pl.BlockSpec((TN, 1), lambda i, j: (i, 0)),
            pl.BlockSpec((1, TM), lambda i, j: (0, j)),
            pl.BlockSpec((TN, 1), lambda i, j: (i, 0)),     # a
            pl.BlockSpec((1, TM), lambda i, j: (0, j)),     # b
            pl.BlockSpec((1, TM), lambda i, j: (0, j)),     # y_w * v
            pl.BlockSpec((TN, 1), lambda i, j: (i, 0)),     # x_w
        ],
        out_specs=pl.BlockSpec((TN, 1), lambda i, j: (i, 0)),
        compiler_params=_cparams(("parallel", "arbitrary")),
    )


# row online-LSE of t = -C/eps - g/eps + log(yw)   (reduce over M)
def _lse_rows_kernel(x_ref, y_ref, x2_ref, y2_ref, g_ref, lyw_ref, o_ref,
                     m_acc, s_acc, *, c_scale, inv_eps):
    j = pl.program_id(1)

    @pl.when(j == 0)
    def _init():
        m_acc[...] = jnp.full(m_acc.shape, -jnp.inf, m_acc.dtype)
        s_acc[...] = jnp.zeros(s_acc.shape, s_acc.dtype)

    c_eps = _tile_c_eps(x_ref, y_ref, x2_ref, y2_ref, c_scale)
    t = -c_eps - g_ref[...] * inv_eps + lyw_ref[...]
    m_new = jnp.maximum(m_acc[...], jnp.max(t, axis=1, keepdims=True))
    m_safe = jnp.where(m_new == -jnp.inf, 0.0, m_new)
    s_acc[...] = (s_acc[...] * jnp.exp(m_acc[...] - m_safe)
                  + jnp.sum(jnp.exp(t - m_safe), axis=1, keepdims=True))
    m_acc[...] = m_new

    @pl.when(j == pl.num_programs(1) - 1)
    def _fin():
        o_ref[...] = m_acc[...] + jnp.log(s_acc[...])


def _build_lse_rows_fn(Np, Mp, D, TN, TM, c_scale, inv_eps):
    kernel = functools.partial(_lse_rows_kernel, c_scale=c_scale,
                               inv_eps=inv_eps)
    return pl.pallas_call(
        kernel,
        out_shape=jax.ShapeDtypeStruct((Np, 1), jnp.float32),
        grid=(Np // TN, Mp // TM),
        in_specs=[
            pl.BlockSpec((TN, D), lambda i, j: (i, 0)),
            pl.BlockSpec((TM, D), lambda i, j: (j, 0)),
            pl.BlockSpec((TN, 1), lambda i, j: (i, 0)),
            pl.BlockSpec((1, TM), lambda i, j: (0, j)),
            pl.BlockSpec((1, TM), lambda i, j: (0, j)),     # g
            pl.BlockSpec((1, TM), lambda i, j: (0, j)),     # log(y_w)
        ],
        out_specs=pl.BlockSpec((TN, 1), lambda i, j: (i, 0)),
        scratch_shapes=[pltpu.VMEM((TN, 1), jnp.float32),
                        pltpu.VMEM((TN, 1), jnp.float32)],
        compiler_params=_cparams(("parallel", "arbitrary")),
    )


# column online-LSE of t = -C/eps - f/eps + log(xw)   (reduce over N)
def _lse_cols_kernel(x_ref, y_ref, x2_ref, y2_ref, f_ref, lxw_ref, o_ref,
                     m_acc, s_acc, *, c_scale, inv_eps):
    i = pl.program_id(1)

    @pl.when(i == 0)
    def _init():
        m_acc[...] = jnp.full(m_acc.shape, -jnp.inf, m_acc.dtype)
        s_acc[...] = jnp.zeros(s_acc.shape, s_acc.dtype)

    c_eps = _tile_c_eps(x_ref, y_ref, x2_ref, y2_ref, c_scale)
    t = -c_eps - f_ref[...] * inv_eps + lxw_ref[...]
    m_new = jnp.maximum(m_acc[...], jnp.max(t, axis=0, keepdims=True))
    m_safe = jnp.where(m_new == -jnp.inf, 0.0, m_new)
    s_acc[...] = (s_acc[...] * jnp.exp(m_acc[...] - m_safe)
                  + jnp.sum(jnp.exp(t - m_safe), axis=0, keepdims=True))
    m_acc[...] = m_new

    @pl.when(i == pl.num_programs(1) - 1)
    def _fin():
        o_ref[...] = m_acc[...] + jnp.log(s_acc[...])


def _build_lse_cols_fn(Np, Mp, D, TN, TM, c_scale, inv_eps):
    kernel = functools.partial(_lse_cols_kernel, c_scale=c_scale,
                               inv_eps=inv_eps)
    return pl.pallas_call(
        kernel,
        out_shape=jax.ShapeDtypeStruct((1, Mp), jnp.float32),
        grid=(Mp // TM, Np // TN),
        in_specs=[
            pl.BlockSpec((TN, D), lambda j, i: (i, 0)),
            pl.BlockSpec((TM, D), lambda j, i: (j, 0)),
            pl.BlockSpec((TN, 1), lambda j, i: (i, 0)),
            pl.BlockSpec((1, TM), lambda j, i: (0, j)),
            pl.BlockSpec((TN, 1), lambda j, i: (i, 0)),     # f
            pl.BlockSpec((TN, 1), lambda j, i: (i, 0)),     # log(x_w)
        ],
        out_specs=pl.BlockSpec((1, TM), lambda j, i: (0, j)),
        scratch_shapes=[pltpu.VMEM((1, TM), jnp.float32),
                        pltpu.VMEM((1, TM), jnp.float32)],
        compiler_params=_cparams(("parallel", "arbitrary")),
    )


# col_j = sum_i exp(-(C + f_cts_i + g_cts_j)/eps - logZ) * xw_i
def _dual_cols_kernel(x_ref, y_ref, x2_ref, y2_ref, fc_ref, gc_ref, xw_ref,
                      o_ref, *, c_scale, inv_eps, logZ):
    @pl.when(pl.program_id(1) == 0)
    def _init():
        o_ref[...] = jnp.zeros(o_ref.shape, o_ref.dtype)

    c_eps = _tile_c_eps(x_ref, y_ref, x2_ref, y2_ref, c_scale)
    e = jnp.exp(-(c_eps + fc_ref[...] * inv_eps + gc_ref[...] * inv_eps) - logZ)
    o_ref[...] += jnp.sum(e * xw_ref[...], axis=0, keepdims=True)


def _build_dual_cols_fn(Np, Mp, D, TN, TM, c_scale, inv_eps, logZ):
    kernel = functools.partial(_dual_cols_kernel, c_scale=c_scale,
                               inv_eps=inv_eps, logZ=logZ)
    return pl.pallas_call(
        kernel,
        out_shape=jax.ShapeDtypeStruct((1, Mp), jnp.float32),
        grid=(Mp // TM, Np // TN),
        in_specs=[
            pl.BlockSpec((TN, D), lambda j, i: (i, 0)),
            pl.BlockSpec((TM, D), lambda j, i: (j, 0)),
            pl.BlockSpec((TN, 1), lambda j, i: (i, 0)),
            pl.BlockSpec((1, TM), lambda j, i: (0, j)),
            pl.BlockSpec((TN, 1), lambda j, i: (i, 0)),     # f_cts
            pl.BlockSpec((1, TM), lambda j, i: (0, j)),     # g_cts
            pl.BlockSpec((TN, 1), lambda j, i: (i, 0)),     # x_w
        ],
        out_specs=pl.BlockSpec((1, TM), lambda j, i: (0, j)),
        compiler_params=_cparams(("parallel", "arbitrary")),
    )


# ---------------------------------------------------------------------------
# Forward (functional equivalent of SinkhornLoss.forward, warm_start=False)
# ---------------------------------------------------------------------------
def sinkhorn_loss_forward(x_spt, x_w, y_spt, y_w, *, eps, n_iter, scale_factor,
                          lamda1=None, lamda2=None, atol=1e-4, rtol=1e-4,
                          thresh=100.0, force_streaming=False):
    x_spt = jnp.asarray(x_spt, jnp.float32)
    y_spt = jnp.asarray(y_spt, jnp.float32)
    x_w = jnp.asarray(x_w, jnp.float32)
    y_w = jnp.asarray(y_w, jnp.float32)

    N, D = x_spt.shape
    M = y_spt.shape[0]
    logZ = math.log((2.0 * math.pi * eps) ** (D / 2.0))
    inv_eps = 1.0 / eps
    c_scale = inv_eps / (2.0 * scale_factor ** 2)      # sqdist * c_scale = C/eps
    balanced = (lamda1 is None) and (lamda2 is None)

    # Fused single-call path when the whole C comfortably fits in VMEM
    # (conservative for v7x's 64 MiB physical VMEM per TensorCore).
    fused = (not force_streaming) and (
        _round_up(N, 8) * _round_up(M, 128) * 4 <= 4 * 1024 * 1024)

    if fused:
        TN, TM = _round_up(N, 8), _round_up(M, 128)
    else:
        TN = min(512, _round_up(N, 8))
        TM = min(1024, _round_up(M, 128))
    Np = _round_up(N, TN)
    Mp = _round_up(M, TM)

    # Padded points replicate the first real point (finite, in-range costs)
    # and carry zero weight -> they contribute exactly zero everywhere.
    x_p = jnp.zeros((Np, D), jnp.float32).at[:N].set(x_spt).at[N:].set(x_spt[0])
    y_p = jnp.zeros((Mp, D), jnp.float32).at[:M].set(y_spt).at[M:].set(y_spt[0])
    xw_col = jnp.zeros((Np, 1), jnp.float32).at[:N, 0].set(x_w)
    yw_row = jnp.zeros((1, Mp), jnp.float32).at[0, :M].set(y_w)
    x2_col = jnp.sum(x_p * x_p, axis=1, keepdims=True)
    y2_row = jnp.sum(y_p * y_p, axis=1, keepdims=True).T
    log_xw = jnp.log(xw_col)          # -inf on padding -> drops out of LSE/exp
    log_yw = jnp.log(yw_row)
    mask_n = (jnp.arange(Np) < N).reshape(Np, 1)
    mask_m = (jnp.arange(Mp) < M).reshape(1, Mp)
    mn_f = mask_n.astype(jnp.float32)
    mm_f = mask_m.astype(jnp.float32)

    if fused:
        fused_fn = _build_fused_fn(Np, Mp, D, eps=eps, logZ=logZ,
                                   c_scale=c_scale, n_iter=n_iter, atol=atol,
                                   rtol=rtol, thresh=thresh, lamda1=lamda1,
                                   lamda2=lamda2)
        f_cts, g_cts, col_mass = fused_fn(x_p, y_p, x2_col, y2_row, xw_col,
                                          yw_row, log_xw, log_yw, mn_f, mm_f)
    else:
        ktu_fn = _build_ktu_fn(Np, Mp, D, TN, TM, c_scale, inv_eps, logZ)
        kv_fn = _build_kv_fn(Np, Mp, D, TN, TM, c_scale, inv_eps, logZ)
        lse_rows_fn = _build_lse_rows_fn(Np, Mp, D, TN, TM, c_scale, inv_eps)
        lse_cols_fn = _build_lse_cols_fn(Np, Mp, D, TN, TM, c_scale, inv_eps)
        dual_cols_fn = _build_dual_cols_fn(Np, Mp, D, TN, TM, c_scale,
                                           inv_eps, logZ)

        def ktu(a, b, u):
            return ktu_fn(x_p, y_p, x2_col, y2_row, a, b, xw_col * u, yw_row)

        def kv(a, b, v):
            return kv_fn(x_p, y_p, x2_col, y2_row, a, b, yw_row * v, xw_col)

        yw_inf = jnp.max(jnp.abs(yw_row) * mm_f)

        u0 = jnp.ones((Np, 1), jnp.float32)
        v0 = jnp.ones((1, Mp), jnp.float32)
        a0 = jnp.zeros((Np, 1), jnp.float32)
        b0 = jnp.zeros((1, Mp), jnp.float32)
        s0 = ktu(a0, b0, u0)

        def cond_fn(c):
            return jnp.logical_and(c[0] < n_iter, jnp.logical_not(c[1]))

        def body_fn(c):
            it, _, u_prev, u, v, a, b, s = c
            safe_s = jnp.where(mask_m, s, 1.0)
            v_new = jnp.where(mask_m, _proxdiv(yw_row, safe_s, b, lamda1, eps),
                              1.0)
            r = kv(a, b, v_new)
            safe_r = jnp.where(mask_n, r, 1.0)
            u_new = jnp.where(mask_n, _proxdiv(xw_col, safe_r, a, lamda2, eps),
                              1.0)
            s_new = ktu(a, b, u_new)
            if balanced:
                err = jnp.max(jnp.abs(v_new * s_new - yw_row) * mm_f)
                conv = jnp.logical_or(err < atol, err < rtol * yw_inf)
            else:
                # TODO(synk): PyTorch aliases u_prev to u (copy_), which makes
                # its check degenerate; intended non-aliased check used here.
                err = jnp.max(jnp.abs(u_new - u_prev) * mn_f)
                u_inf = jnp.max(jnp.abs(u_new) * mn_f)
                conv = jnp.logical_or(err < atol, err < rtol * u_inf)
            u_inf2 = jnp.max(jnp.abs(u_new) * mn_f)
            v_inf2 = jnp.max(jnp.abs(v_new) * mm_f)
            absorb = jnp.logical_and(jnp.maximum(u_inf2, v_inf2) > thresh,
                                     jnp.logical_not(conv))
            a_new = jnp.where(absorb, a - eps * jnp.log(u_new), a)
            b_new = jnp.where(absorb, b - eps * jnp.log(v_new), b)
            # After absorption K' = K * u_i * v_j  =>  K'^T 1 == v * (K^T u).
            s_out = jnp.where(absorb, v_new * s_new, s_new)
            u_out = jnp.where(absorb, jnp.ones_like(u_new), u_new)
            v_out = jnp.where(absorb, jnp.ones_like(v_new), v_new)
            return (it + 1, conv, u_new, u_out, v_out, a_new, b_new, s_out)

        init = (jnp.array(0, jnp.int32), jnp.array(False),
                u0, u0, v0, a0, b0, s0)
        _, _, _, u, v, a, b, _ = lax.while_loop(cond_fn, body_fn, init)

        f = -eps * jnp.log(u) + a                       # (Np, 1)
        g = -eps * jnp.log(v) + b                       # (1, Mp)
        f_cts = eps * lse_rows_fn(x_p, y_p, x2_col, y2_row, g, log_yw) \
            - eps * logZ
        g_cts = eps * lse_cols_fn(x_p, y_p, x2_col, y2_row, f, log_xw) \
            - eps * logZ
        col_mass = dual_cols_fn(x_p, y_p, x2_col, y2_row, f_cts, g_cts, xw_col)

    if lamda1 is None:
        f1 = jnp.sum(f_cts * xw_col)
    else:
        f1 = lamda1 * jnp.sum(xw_col * (jnp.exp(f_cts / lamda1) - 1.0))
    if lamda2 is None:
        f2 = jnp.sum(g_cts * yw_row)
    else:
        f2 = lamda2 * jnp.sum(yw_row * (jnp.exp(g_cts / lamda2) - 1.0))
    total_mass = jnp.sum(col_mass * yw_row)

    # TODO(synk): warm_start=True state carry-over (module statefulness) is not
    # reproduced; this is the default warm_start=False forward path.
    return -f1 - f2 - eps * total_mass


# ---------------------------------------------------------------------------
# Plain-JAX reference matching the PyTorch semantics (for validation)
# ---------------------------------------------------------------------------
def _sinkhorn_loss_ref(x_spt, x_w, y_spt, y_w, *, eps, n_iter, scale_factor,
                       lamda1=None, lamda2=None, atol=1e-4, rtol=1e-4,
                       thresh=100.0):
    d = x_spt.shape[1]
    logZ = math.log((2.0 * math.pi * eps) ** (d / 2.0))
    diff = x_spt[:, None, :] - y_spt[None, :, :]
    C = jnp.sum(diff * diff, axis=-1) / (2.0 * scale_factor ** 2)

    def getK(a, b):
        return (jnp.exp(-(C + a[:, None] + b[None, :]) / eps - logZ)
                * x_w[:, None] * y_w[None, :])

    def proxdiv(p, s, dual, lamda):
        if lamda is None:
            return p / s
        return (p / s) ** (lamda / (lamda + eps)) * jnp.exp(dual / (lamda + eps))

    u = jnp.ones_like(x_w)
    v = jnp.ones_like(y_w)
    a = jnp.zeros_like(x_w)
    b = jnp.zeros_like(y_w)
    K = getK(a, b)
    u_prev = u
    balanced = (lamda1 is None) and (lamda2 is None)
    for _ in range(n_iter):
        v = proxdiv(y_w, K.T @ u, b, lamda1)
        u = proxdiv(x_w, K @ v, a, lamda2)
        if balanced:
            err = float(jnp.max(jnp.abs(v * (K.T @ u) - y_w)))
            if err < atol or err / float(jnp.max(jnp.abs(y_w))) < rtol:
                break
        else:
            err = float(jnp.max(jnp.abs(u - u_prev)))
            if err < atol or err / float(jnp.max(jnp.abs(u))) < rtol:
                break
            u_prev = u
        if max(float(jnp.max(jnp.abs(u))), float(jnp.max(jnp.abs(v)))) > thresh:
            a = a - eps * jnp.log(u)
            b = b - eps * jnp.log(v)
            u = jnp.ones_like(u)
            v = jnp.ones_like(v)
            K = getK(a, b)

    f = -eps * jnp.log(u) + a
    g = -eps * jnp.log(v) + b
    f_cts = eps * jax.scipy.special.logsumexp(
        (-C - g[None, :]) / eps + jnp.log(y_w)[None, :], axis=1) - eps * logZ
    g_cts = eps * jax.scipy.special.logsumexp(
        (-C - f[:, None]) / eps + jnp.log(x_w)[:, None], axis=0) - eps * logZ
    if lamda1 is None:
        f1 = jnp.dot(f_cts, x_w)
    else:
        f1 = lamda1 * jnp.dot(x_w, jnp.exp(f_cts / lamda1) - 1.0)
    if lamda2 is None:
        f2 = jnp.dot(g_cts, y_w)
    else:
        f2 = lamda2 * jnp.dot(y_w, jnp.exp(g_cts / lamda2) - 1.0)
    total = jnp.sum(jnp.exp(-(C + f_cts[:, None] + g_cts[None, :]) / eps - logZ)
                    * x_w[:, None] * y_w[None, :])
    return -f1 - f2 - eps * total


if __name__ == "__main__":
    key = jax.random.PRNGKey(0)
    k1, k2, k3, k4 = jax.random.split(key, 4)

    N, M, D = 24, 40, 6
    eps = 0.5
    n_iter = 80
    scale_factor = 1.0

    x_spt = jax.random.normal(k1, (N, D), dtype=jnp.float32)
    y_spt = jax.random.normal(k2, (M, D), dtype=jnp.float32) + 0.5
    x_w = jax.random.uniform(k3, (N,), minval=0.5, maxval=1.5, dtype=jnp.float32)
    y_w = jax.random.uniform(k4, (M,), minval=0.5, maxval=1.5, dtype=jnp.float32)
    x_w = x_w / jnp.sum(x_w)   # balanced transport: equal total mass
    y_w = y_w / jnp.sum(y_w)

    ref = _sinkhorn_loss_ref(x_spt, x_w, y_spt, y_w, eps=eps, n_iter=n_iter,
                             scale_factor=scale_factor)
    ref = jax.block_until_ready(ref)

    # Fused single-pallas_call path (whole Sinkhorn loop in VMEM).
    loss_fused = sinkhorn_loss_forward(x_spt, x_w, y_spt, y_w, eps=eps,
                                       n_iter=n_iter, scale_factor=scale_factor)
    loss_fused = jax.block_until_ready(loss_fused)

    # Tiled streaming path (C recomputed per tile, on-device while_loop).
    loss_stream = sinkhorn_loss_forward(x_spt, x_w, y_spt, y_w, eps=eps,
                                        n_iter=n_iter,
                                        scale_factor=scale_factor,
                                        force_streaming=True)
    loss_stream = jax.block_until_ready(loss_stream)

    assert bool(jnp.isfinite(loss_fused)), float(loss_fused)
    assert bool(jnp.isfinite(loss_stream)), float(loss_stream)
    assert jnp.allclose(loss_fused, ref, rtol=1e-2, atol=1e-2), (
        float(loss_fused), float(ref))
    assert jnp.allclose(loss_stream, ref, rtol=1e-2, atol=1e-2), (
        float(loss_stream), float(ref))

    print("KERNEL_OK")
</pallas_src>

<mosaic_0001>
module attributes {stable_mosaic.version = 11 : i64} {
  func.func @_fused_kernel(%arg0: i32, %arg1: memref<24x6xf32, #tpu.memory_space<vmem>>, %arg2: memref<128x6xf32, #tpu.memory_space<vmem>>, %arg3: memref<24x1xf32, #tpu.memory_space<vmem>>, %arg4: memref<1x128xf32, #tpu.memory_space<vmem>>, %arg5: memref<24x1xf32, #tpu.memory_space<vmem>>, %arg6: memref<1x128xf32, #tpu.memory_space<vmem>>, %arg7: memref<24x1xf32, #tpu.memory_space<vmem>>, %arg8: memref<1x128xf32, #tpu.memory_space<vmem>>, %arg9: memref<24x1xf32, #tpu.memory_space<vmem>>, %arg10: memref<1x128xf32, #tpu.memory_space<vmem>>, %arg11: memref<24x1xf32, #tpu.memory_space<vmem>>, %arg12: memref<1x128xf32, #tpu.memory_space<vmem>>, %arg13: memref<1x128xf32, #tpu.memory_space<vmem>>) attributes {dimension_semantics = [#tpu.dimension_semantics<arbitrary>], iteration_bounds = array<i64: 1>, scalar_prefetch = 0 : i64, scratch_operands = 0 : i64, tpu.core_type = #tpu.core_type<tc>, window_params = [{pipeline_mode = #tpu.pipeline_mode<synchronous>, transform_indices = @transform_0, window_bounds = array<i64: 24, 6>}, {pipeline_mode = #tpu.pipeline_mode<synchronous>, transform_indices = @transform_1, window_bounds = array<i64: 128, 6>}, {pipeline_mode = #tpu.pipeline_mode<synchronous>, transform_indices = @transform_2, window_bounds = array<i64: 24, 1>}, {pipeline_mode = #tpu.pipeline_mode<synchronous>, transform_indices = @transform_3, window_bounds = array<i64: 1, 128>}, {pipeline_mode = #tpu.pipeline_mode<synchronous>, transform_indices = @transform_4, window_bounds = array<i64: 24, 1>}, {pipeline_mode = #tpu.pipeline_mode<synchronous>, transform_indices = @transform_5, window_bounds = array<i64: 1, 128>}, {pipeline_mode = #tpu.pipeline_mode<synchronous>, transform_indices = @transform_6, window_bounds = array<i64: 24, 1>}, {pipeline_mode = #tpu.pipeline_mode<synchronous>, transform_indices = @transform_7, window_bounds = array<i64: 1, 128>}, {pipeline_mode = #tpu.pipeline_mode<synchronous>, transform_indices = @transform_8, window_bounds = array<i64: 24, 1>}, {pipeline_mode = #tpu.pipeline_mode<synchronous>, transform_indices = @transform_9, window_bounds = array<i64: 1, 128>}, {pipeline_mode = #tpu.pipeline_mode<synchronous>, transform_indices = @transform_10, window_bounds = array<i64: 24, 1>}, {pipeline_mode = #tpu.pipeline_mode<synchronous>, transform_indices = @transform_11, window_bounds = array<i64: 1, 128>}, {pipeline_mode = #tpu.pipeline_mode<synchronous>, transform_indices = @transform_12, window_bounds = array<i64: 1, 128>}]} {
    %c0 = arith.constant 0 : index
    %c0_0 = arith.constant 0 : index
    %0 = vector.load %arg1[%c0, %c0_0] : memref<24x6xf32, #tpu.memory_space<vmem>>, vector<24x6xf32>
    %c0_1 = arith.constant 0 : index
    %c0_2 = arith.constant 0 : index
    %1 = vector.load %arg2[%c0_1, %c0_2] : memref<128x6xf32, #tpu.memory_space<vmem>>, vector<128x6xf32>
    %c0_3 = arith.constant 0 : index
    %c0_4 = arith.constant 0 : index
    %2 = vector.load %arg5[%c0_3, %c0_4] : memref<24x1xf32, #tpu.memory_space<vmem>>, vector<24x1xf32>
    %c0_5 = arith.constant 0 : index
    %c0_6 = arith.constant 0 : index
    %3 = vector.load %arg6[%c0_5, %c0_6] : memref<1x128xf32, #tpu.memory_space<vmem>>, vector<1x128xf32>
    %c0_7 = arith.constant 0 : index
    %c0_8 = arith.constant 0 : index
    %4 = vector.load %arg7[%c0_7, %c0_8] : memref<24x1xf32, #tpu.memory_space<vmem>>, vector<24x1xf32>
    %c0_9 = arith.constant 0 : index
    %c0_10 = arith.constant 0 : index
    %5 = vector.load %arg8[%c0_9, %c0_10] : memref<1x128xf32, #tpu.memory_space<vmem>>, vector<1x128xf32>
    %c0_11 = arith.constant 0 : index
    %c0_12 = arith.constant 0 : index
    %6 = vector.load %arg9[%c0_11, %c0_12] : memref<24x1xf32, #tpu.memory_space<vmem>>, vector<24x1xf32>
    %c0_13 = arith.constant 0 : index
    %c0_14 = arith.constant 0 : index
    %7 = vector.load %arg10[%c0_13, %c0_14] : memref<1x128xf32, #tpu.memory_space<vmem>>, vector<1x128xf32>
    %cst = arith.constant dense<0.000000e+00> : vector<24x128xf32>
    %8 = tpu.matmul %0, %1, %cst {dimension_numbers = #tpu.dot_dimension_numbers<[1], [1], [0], [0], [0, 0, 1, 0], [], []>} : vector<24x6xf32>, vector<128x6xf32>, vector<24x128xf32> -> vector<24x128xf32>
    %c0_15 = arith.constant 0 : index
    %c0_16 = arith.constant 0 : index
    %9 = vector.load %arg3[%c0_15, %c0_16] : memref<24x1xf32, #tpu.memory_space<vmem>>, vector<24x1xf32>
    %c0_17 = arith.constant 0 : index
    %c0_18 = arith.constant 0 : index
    %10 = vector.load %arg4[%c0_17, %c0_18] : memref<1x128xf32, #tpu.memory_space<vmem>>, vector<1x128xf32>
    %11 = vector.broadcast %9 : vector<24x1xf32> to vector<24x128xf32>
    %12 = vector.broadcast %10 : vector<1x128xf32> to vector<24x128xf32>
    %13 = arith.addf %11, %12 : vector<24x128xf32>
    %cst_19 = arith.constant 2.000000e+00 : f32
    %14 = vector.broadcast %cst_19 : f32 to vector<24x128xf32>
    %15 = arith.mulf %14, %8 : vector<24x128xf32>
    %16 = arith.subf %13, %15 : vector<24x128xf32>
    %cst_20 = arith.constant 0.000000e+00 : f32
    %17 = vector.broadcast %cst_20 : f32 to vector<24x128xf32>
    %18 = arith.maximumf %16, %17 : vector<24x128xf32>
    %cst_21 = arith.constant 1.000000e+00 : f32
    %19 = vector.broadcast %cst_21 : f32 to vector<24x128xf32>
    %20 = arith.mulf %18, %19 : vector<24x128xf32>
    %21 = math.absf %3 : vector<1x128xf32>
    %22 = arith.mulf %21, %7 : vector<1x128xf32>
    %cst_22 = arith.constant dense<0xFF800000> : vector<1xf32>
    %23 = vector.multi_reduction <maximumf>, %22, %cst_22 [1] : vector<1x128xf32> to vector<1xf32>
    %24 = vector.shape_cast %23 : vector<1xf32> to vector<1x1xf32>
    %cst_23 = arith.constant 1.000000e+00 : f32
    %25 = vector.broadcast %cst_23 : f32 to vector<24x1xf32>
    %cst_24 = arith.constant 1.000000e+00 : f32
    %26 = vector.broadcast %cst_24 : f32 to vector<1x128xf32>
    %cst_25 = arith.constant 0.000000e+00 : f32
    %27 = vector.broadcast %cst_25 : f32 to vector<24x1xf32>
    %cst_26 = arith.constant 0.000000e+00 : f32
    %28 = vector.broadcast %cst_26 : f32 to vector<1x128xf32>
    %cst_27 = arith.constant 0.000000e+00 : f32
    %29 = vector.broadcast %cst_27 : f32 to vector<24x128xf32>
    %30 = arith.subf %29, %20 : vector<24x128xf32>
    %cst_28 = arith.constant 3.43418956 : f32
    %31 = vector.broadcast %cst_28 : f32 to vector<24x128xf32>
    %32 = arith.subf %30, %31 : vector<24x128xf32>
    %33 = math.exp %32 : vector<24x128xf32>
    %34 = vector.broadcast %2 : vector<24x1xf32> to vector<24x128xf32>
    %35 = arith.mulf %33, %34 : vector<24x128xf32>
    %cst_29 = arith.constant dense<0.000000e+00> : vector<128xf32>
    %36 = vector.multi_reduction <add>, %35, %cst_29 [0] : vector<24x128xf32> to vector<128xf32>
    %37 = vector.shape_cast %36 : vector<128xf32> to vector<1x128xf32>
    %38 = arith.mulf %37, %3 : vector<1x128xf32>
    %c0_i32 = arith.constant 0 : i32
    %39 = vector.broadcast %c0_i32 : i32 to vector<1x1xi32>
    %c0_i32_30 = arith.constant 0 : i32
    %c80_i32 = arith.constant 80 : i32
    %40 = arith.addi %c0_i32_30, %c80_i32 : i32
    %c1_i32 = arith.constant 1 : i32
    %41:6 = scf.for %arg14 = %c0_i32_30 to %40 step %c1_i32 iter_args(%arg15 = %39, %arg16 = %25, %arg17 = %26, %arg18 = %27, %arg19 = %28, %arg20 = %38) -> (vector<1x1xi32>, vector<24x1xf32>, vector<1x128xf32>, vector<24x1xf32>, vector<1x128xf32>, vector<1x128xf32>)  : i32 {
      %c0_i32_60 = arith.constant 0 : i32
      %120 = vector.broadcast %c0_i32_60 : i32 to vector<1x1xi32>
      %121 = arith.cmpi eq, %arg15, %120 : vector<1x1xi32>
      %cst_61 = arith.constant 0.000000e+00 : f32
      %122 = vector.broadcast %cst_61 : f32 to vector<1x128xf32>
      %123 = arith.cmpf ogt, %7, %122 : vector<1x128xf32>
      %cst_62 = arith.constant 1.000000e+00 : f32
      %124 = vector.broadcast %cst_62 : f32 to vector<1x128xf32>
      %125 = arith.select %123, %arg20, %124 : vector<1x128xi1>, vector<1x128xf32>
      %cst_63 = arith.constant 0.000000e+00 : f32
      %126 = vector.broadcast %cst_63 : f32 to vector<1x128xf32>
      %127 = arith.cmpf ogt, %7, %126 : vector<1x128xf32>
      %128 = arith.divf %3, %125 : vector<1x128xf32>
      %cst_64 = arith.constant 1.000000e+00 : f32
      %129 = vector.broadcast %cst_64 : f32 to vector<1x128xf32>
      %130 = arith.select %127, %128, %129 : vector<1x128xi1>, vector<1x128xf32>
      %cst_65 = arith.constant 2.000000e+00 : f32
      %131 = vector.broadcast %cst_65 : f32 to vector<24x1xf32>
      %132 = arith.mulf %arg18, %131 : vector<24x1xf32>
      %133 = vector.broadcast %132 : vector<24x1xf32> to vector<24x128xf32>
      %134 = arith.addf %20, %133 : vector<24x128xf32>
      %cst_66 = arith.constant 2.000000e+00 : f32
      %135 = vector.broadcast %cst_66 : f32 to vector<1x128xf32>
      %136 = arith.mulf %arg19, %135 : vector<1x128xf32>
      %137 = vector.broadcast %136 : vector<1x128xf32> to vector<24x128xf32>
      %138 = arith.addf %134, %137 : vector<24x128xf32>
      %cst_67 = arith.constant 0.000000e+00 : f32
      %139 = vector.broadcast %cst_67 : f32 to vector<24x128xf32>
      %140 = arith.subf %139, %138 : vector<24x128xf32>
      %cst_68 = arith.constant 3.43418956 : f32
      %141 = vector.broadcast %cst_68 : f32 to vector<24x128xf32>
      %142 = arith.subf %140, %141 : vector<24x128xf32>
      %143 = math.exp %142 : vector<24x128xf32>
      %144 = arith.mulf %3, %130 : vector<1x128xf32>
      %145 = vector.broadcast %144 : vector<1x128xf32> to vector<24x128xf32>
      %146 = arith.mulf %143, %145 : vector<24x128xf32>
      %cst_69 = arith.constant dense<0.000000e+00> : vector<24xf32>
      %147 = vector.multi_reduction <add>, %146, %cst_69 [1] : vector<24x128xf32> to vector<24xf32>
      %148 = vector.shape_cast %147 : vector<24xf32> to vector<24x1xf32>
      %149 = arith.mulf %148, %2 : vector<24x1xf32>
      %cst_70 = arith.constant 0.000000e+00 : f32
      %150 = vector.broadcast %cst_70 : f32 to vector<24x1xf32>
      %151 = arith.cmpf ogt, %6, %150 : vector<24x1xf32>
      %cst_71 = arith.constant 1.000000e+00 : f32
      %152 = vector.broadcast %cst_71 : f32 to vector<24x1xf32>
      %153 = arith.select %151, %149, %152 : vector<24x1xi1>, vector<24x1xf32>
      %cst_72 = arith.constant 0.000000e+00 : f32
      %154 = vector.broadcast %cst_72 : f32 to vector<24x1xf32>
      %155 = arith.cmpf ogt, %6, %154 : vector<24x1xf32>
      %156 = arith.divf %2, %153 : vector<24x1xf32>
      %cst_73 = arith.constant 1.000000e+00 : f32
      %157 = vector.broadcast %cst_73 : f32 to vector<24x1xf32>
      %158 = arith.select %155, %156, %157 : vector<24x1xi1>, vector<24x1xf32>
      %159 = arith.mulf %2, %158 : vector<24x1xf32>
      %160 = vector.broadcast %159 : vector<24x1xf32> to vector<24x128xf32>
      %161 = arith.mulf %143, %160 : vector<24x128xf32>
      %cst_74 = arith.constant dense<0.000000e+00> : vector<128xf32>
      %162 = vector.multi_reduction <add>, %161, %cst_74 [0] : vector<24x128xf32> to vector<128xf32>
      %163 = vector.shape_cast %162 : vector<128xf32> to vector<1x128xf32>
      %164 = arith.mulf %163, %3 : vector<1x128xf32>
      %165 = arith.mulf %130, %164 : vector<1x128xf32>
      %166 = arith.subf %165, %3 : vector<1x128xf32>
      %167 = math.absf %166 : vector<1x128xf32>
      %168 = arith.mulf %167, %7 : vector<1x128xf32>
      %cst_75 = arith.constant dense<0xFF800000> : vector<1xf32>
      %169 = vector.multi_reduction <maximumf>, %168, %cst_75 [1] : vector<1x128xf32> to vector<1xf32>
      %170 = vector.shape_cast %169 : vector<1xf32> to vector<1x1xf32>
      %cst_76 = arith.constant 9.99999974E-5 : f32
      %171 = vector.broadcast %cst_76 : f32 to vector<1x1xf32>
      %172 = arith.cmpf olt, %170, %171 : vector<1x1xf32>
      %cst_77 = arith.constant 9.99999974E-5 : f32
      %173 = vector.broadcast %cst_77 : f32 to vector<1x1xf32>
      %174 = arith.mulf %173, %24 : vector<1x1xf32>
      %175 = arith.cmpf olt, %170, %174 : vector<1x1xf32>
      %176 = arith.ori %172, %175 : vector<1x1xi1>
      %177 = math.absf %158 : vector<24x1xf32>
      %178 = arith.mulf %177, %6 : vector<24x1xf32>
      %cst_78 = arith.constant dense<0xFF800000> : vector<1xf32>
      %179 = vector.multi_reduction <maximumf>, %178, %cst_78 [0] : vector<24x1xf32> to vector<1xf32>
      %180 = vector.shape_cast %179 : vector<1xf32> to vector<1x1xf32>
      %181 = math.absf %130 : vector<1x128xf32>
      %182 = arith.mulf %181, %7 : vector<1x128xf32>
      %cst_79 = arith.constant dense<0xFF800000> : vector<1xf32>
      %183 = vector.multi_reduction <maximumf>, %182, %cst_79 [1] : vector<1x128xf32> to vector<1xf32>
      %184 = vector.shape_cast %183 : vector<1xf32> to vector<1x1xf32>
      %185 = arith.maximumf %180, %184 : vector<1x1xf32>
      %cst_80 = arith.constant 1.000000e+02 : f32
      %186 = vector.broadcast %cst_80 : f32 to vector<1x1xf32>
      %187 = arith.cmpf ogt, %185, %186 : vector<1x1xf32>
      %cst_81 = arith.constant dense<true> : vector<1x1xi1>
      %188 = arith.xori %176, %cst_81 : vector<1x1xi1>
      %189 = arith.andi %187, %188 : vector<1x1xi1>
      %190 = math.log %158 : vector<24x1xf32>
      %cst_82 = arith.constant 5.000000e-01 : f32
      %191 = vector.broadcast %cst_82 : f32 to vector<24x1xf32>
      %192 = arith.mulf %191, %190 : vector<24x1xf32>
      %193 = arith.subf %arg18, %192 : vector<24x1xf32>
      %194 = vector.shape_cast %189 : vector<1x1xi1> to vector<1x1xi1>
      %195 = vector.broadcast %194 : vector<1x1xi1> to vector<24x1xi1>
      %196 = arith.select %195, %193, %arg18 : vector<24x1xi1>, vector<24x1xf32>
      %197 = math.log %130 : vector<1x128xf32>
      %cst_83 = arith.constant 5.000000e-01 : f32
      %198 = vector.broadcast %cst_83 : f32 to vector<1x128xf32>
      %199 = arith.mulf %198, %197 : vector<1x128xf32>
      %200 = arith.subf %arg19, %199 : vector<1x128xf32>
      %201 = vector.shape_cast %189 : vector<1x1xi1> to vector<1x1xi1>
      %202 = vector.broadcast %201 : vector<1x1xi1> to vector<1x128xi1>
      %203 = arith.select %202, %200, %arg19 : vector<1x128xi1>, vector<1x128xf32>
      %204 = arith.mulf %130, %164 : vector<1x128xf32>
      %205 = vector.shape_cast %189 : vector<1x1xi1> to vector<1x1xi1>
      %206 = vector.broadcast %205 : vector<1x1xi1> to vector<1x128xi1>
      %207 = arith.select %206, %204, %164 : vector<1x128xi1>, vector<1x128xf32>
      %208 = vector.shape_cast %189 : vector<1x1xi1> to vector<1x1xi1>
      %209 = vector.broadcast %208 : vector<1x1xi1> to vector<24x1xi1>
      %210 = arith.select %209, %25, %158 : vector<24x1xi1>, vector<24x1xf32>
      %211 = vector.shape_cast %189 : vector<1x1xi1> to vector<1x1xi1>
      %212 = vector.broadcast %211 : vector<1x1xi1> to vector<1x128xi1>
      %213 = arith.select %212, %26, %130 : vector<1x128xi1>, vector<1x128xf32>
      %c1_i32_84 = arith.constant 1 : i32
      %214 = vector.broadcast %c1_i32_84 : i32 to vector<1x1xi32>
      %215 = arith.select %176, %214, %arg15 : vector<1x1xi1>, vector<1x1xi32>
      %216 = arith.select %121, %215, %arg15 : vector<1x1xi1>, vector<1x1xi32>
      %217 = vector.shape_cast %121 : vector<1x1xi1> to vector<1x1xi1>
      %218 = vector.broadcast %217 : vector<1x1xi1> to vector<24x1xi1>
      %219 = arith.select %218, %210, %arg16 : vector<24x1xi1>, vector<24x1xf32>
      %220 = vector.shape_cast %121 : vector<1x1xi1> to vector<1x1xi1>
      %221 = vector.broadcast %220 : vector<1x1xi1> to vector<1x128xi1>
      %222 = arith.select %221, %213, %arg17 : vector<1x128xi1>, vector<1x128xf32>
      %223 = vector.shape_cast %121 : vector<1x1xi1> to vector<1x1xi1>
      %224 = vector.broadcast %223 : vector<1x1xi1> to vector<24x1xi1>
      %225 = arith.select %224, %196, %arg18 : vector<24x1xi1>, vector<24x1xf32>
      %226 = vector.shape_cast %121 : vector<1x1xi1> to vector<1x1xi1>
      %227 = vector.broadcast %226 : vector<1x1xi1> to vector<1x128xi1>
      %228 = arith.select %227, %203, %arg19 : vector<1x128xi1>, vector<1x128xf32>
      %229 = vector.shape_cast %121 : vector<1x1xi1> to vector<1x1xi1>
      %230 = vector.broadcast %229 : vector<1x1xi1> to vector<1x128xi1>
      %231 = arith.select %230, %207, %arg20 : vector<1x128xi1>, vector<1x128xf32>
      scf.yield %216, %219, %222, %225, %228, %231 : vector<1x1xi32>, vector<24x1xf32>, vector<1x128xf32>, vector<24x1xf32>, vector<1x128xf32>, vector<1x128xf32>
    }
    %42 = math.log %41#1 : vector<24x1xf32>
    %cst_31 = arith.constant -5.000000e-01 : f32
    %43 = vector.broadcast %cst_31 : f32 to vector<24x1xf32>
    %44 = arith.mulf %43, %42 : vector<24x1xf32>
    %45 = arith.addf %44, %41#3 : vector<24x1xf32>
    %46 = math.log %41#2 : vector<1x128xf32>
    %cst_32 = arith.constant -5.000000e-01 : f32
    %47 = vector.broadcast %cst_32 : f32 to vector<1x128xf32>
    %48 = arith.mulf %47, %46 : vector<1x128xf32>
    %49 = arith.addf %48, %41#4 : vector<1x128xf32>
    %cst_33 = arith.constant 0.000000e+00 : f32
    %50 = vector.broadcast %cst_33 : f32 to vector<24x128xf32>
    %51 = arith.subf %50, %20 : vector<24x128xf32>
    %cst_34 = arith.constant 2.000000e+00 : f32
    %52 = vector.broadcast %cst_34 : f32 to vector<1x128xf32>
    %53 = arith.mulf %49, %52 : vector<1x128xf32>
    %54 = vector.broadcast %53 : vector<1x128xf32> to vector<24x128xf32>
    %55 = arith.subf %51, %54 : vector<24x128xf32>
    %56 = vector.broadcast %5 : vector<1x128xf32> to vector<24x128xf32>
    %57 = arith.addf %55, %56 : vector<24x128xf32>
    %cst_35 = arith.constant dense<0xFF800000> : vector<24xf32>
    %58 = vector.multi_reduction <maximumf>, %57, %cst_35 [1] : vector<24x128xf32> to vector<24xf32>
    %59 = vector.shape_cast %58 : vector<24xf32> to vector<24x1xf32>
    %cst_36 = arith.constant 0xFF800000 : f32
    %60 = vector.broadcast %cst_36 : f32 to vector<24x1xf32>
    %61 = arith.cmpf oeq, %59, %60 : vector<24x1xf32>
    %cst_37 = arith.constant 0.000000e+00 : f32
    %62 = vector.broadcast %cst_37 : f32 to vector<24x1xf32>
    %63 = arith.select %61, %62, %59 : vector<24x1xi1>, vector<24x1xf32>
    %64 = vector.broadcast %63 : vector<24x1xf32> to vector<24x128xf32>
    %65 = arith.subf %57, %64 : vector<24x128xf32>
    %66 = math.exp %65 : vector<24x128xf32>
    %cst_38 = arith.constant dense<0.000000e+00> : vector<24xf32>
    %67 = vector.multi_reduction <add>, %66, %cst_38 [1] : vector<24x128xf32> to vector<24xf32>
    %68 = vector.shape_cast %67 : vector<24xf32> to vector<24x1xf32>
    %69 = math.log %68 : vector<24x1xf32>
    %70 = arith.addf %63, %69 : vector<24x1xf32>
    %cst_39 = arith.constant 5.000000e-01 : f32
    %71 = vector.broadcast %cst_39 : f32 to vector<24x1xf32>
    %72 = arith.mulf %71, %70 : vector<24x1xf32>
    %cst_40 = arith.constant 1.71709478 : f32
    %73 = vector.broadcast %cst_40 : f32 to vector<24x1xf32>
    %74 = arith.subf %72, %73 : vector<24x1xf32>
    %cst_41 = arith.constant 0.000000e+00 : f32
    %75 = vector.broadcast %cst_41 : f32 to vector<24x128xf32>
    %76 = arith.subf %75, %20 : vector<24x128xf32>
    %cst_42 = arith.constant 2.000000e+00 : f32
    %77 = vector.broadcast %cst_42 : f32 to vector<24x1xf32>
    %78 = arith.mulf %45, %77 : vector<24x1xf32>
    %79 = vector.broadcast %78 : vector<24x1xf32> to vector<24x128xf32>
    %80 = arith.subf %76, %79 : vector<24x128xf32>
    %81 = vector.broadcast %4 : vector<24x1xf32> to vector<24x128xf32>
    %82 = arith.addf %80, %81 : vector<24x128xf32>
    %cst_43 = arith.constant dense<0xFF800000> : vector<128xf32>
    %83 = vector.multi_reduction <maximumf>, %82, %cst_43 [0] : vector<24x128xf32> to vector<128xf32>
    %84 = vector.shape_cast %83 : vector<128xf32> to vector<1x128xf32>
    %cst_44 = arith.constant 0xFF800000 : f32
    %85 = vector.broadcast %cst_44 : f32 to vector<1x128xf32>
    %86 = arith.cmpf oeq, %84, %85 : vector<1x128xf32>
    %cst_45 = arith.constant 0.000000e+00 : f32
    %87 = vector.broadcast %cst_45 : f32 to vector<1x128xf32>
    %88 = arith.select %86, %87, %84 : vector<1x128xi1>, vector<1x128xf32>
    %89 = vector.broadcast %88 : vector<1x128xf32> to vector<24x128xf32>
    %90 = arith.subf %82, %89 : vector<24x128xf32>
    %91 = math.exp %90 : vector<24x128xf32>
    %cst_46 = arith.constant dense<0.000000e+00> : vector<128xf32>
    %92 = vector.multi_reduction <add>, %91, %cst_46 [0] : vector<24x128xf32> to vector<128xf32>
    %93 = vector.shape_cast %92 : vector<128xf32> to vector<1x128xf32>
    %94 = math.log %93 : vector<1x128xf32>
    %95 = arith.addf %88, %94 : vector<1x128xf32>
    %cst_47 = arith.constant 5.000000e-01 : f32
    %96 = vector.broadcast %cst_47 : f32 to vector<1x128xf32>
    %97 = arith.mulf %96, %95 : vector<1x128xf32>
    %cst_48 = arith.constant 1.71709478 : f32
    %98 = vector.broadcast %cst_48 : f32 to vector<1x128xf32>
    %99 = arith.subf %97, %98 : vector<1x128xf32>
    %cst_49 = arith.constant 2.000000e+00 : f32
    %100 = vector.broadcast %cst_49 : f32 to vector<24x1xf32>
    %101 = arith.mulf %74, %100 : vector<24x1xf32>
    %102 = vector.broadcast %101 : vector<24x1xf32> to vector<24x128xf32>
    %103 = arith.addf %20, %102 : vector<24x128xf32>
    %cst_50 = arith.constant 2.000000e+00 : f32
    %104 = vector.broadcast %cst_50 : f32 to vector<1x128xf32>
    %105 = arith.mulf %99, %104 : vector<1x128xf32>
    %106 = vector.broadcast %105 : vector<1x128xf32> to vector<24x128xf32>
    %107 = arith.addf %103, %106 : vector<24x128xf32>
    %cst_51 = arith.constant 0.000000e+00 : f32
    %108 = vector.broadcast %cst_51 : f32 to vector<24x128xf32>
    %109 = arith.subf %108, %107 : vector<24x128xf32>
    %cst_52 = arith.constant 3.43418956 : f32
    %110 = vector.broadcast %cst_52 : f32 to vector<24x128xf32>
    %111 = arith.subf %109, %110 : vector<24x128xf32>
    %112 = math.exp %111 : vector<24x128xf32>
    %113 = vector.broadcast %2 : vector<24x1xf32> to vector<24x128xf32>
    %114 = arith.mulf %112, %113 : vector<24x128xf32>
    %cst_53 = arith.constant dense<0.000000e+00> : vector<128xf32>
    %115 = vector.multi_reduction <add>, %114, %cst_53 [0] : vector<24x128xf32> to vector<128xf32>
    %116 = vector.shape_cast %115 : vector<128xf32> to vector<1x128xf32>
    %c0_54 = arith.constant 0 : index
    %c0_55 = arith.constant 0 : index
    %117 = vector.load %arg11[%c0_54, %c0_55] : memref<24x1xf32, #tpu.memory_space<vmem>>, vector<24x1xf32>
    tpu.vector_store %arg11[%c0_54, %c0_55], %74 {strides = array<i32>} : memref<24x1xf32, #tpu.memory_space<vmem>>, vector<24x1xf32>,
    %c0_56 = arith.constant 0 : index
    %c0_57 = arith.constant 0 : index
    %118 = vector.load %arg12[%c0_56, %c0_57] : memref<1x128xf32, #tpu.memory_space<vmem>>, vector<1x128xf32>
    tpu.vector_store %arg12[%c0_56, %c0_57], %99 {strides = array<i32>} : memref<1x128xf32, #tpu.memory_space<vmem>>, vector<1x128xf32>,
    %c0_58 = arith.constant 0 : index
    %c0_59 = arith.constant 0 : index
    %119 = vector.load %arg13[%c0_58, %c0_59] : memref<1x128xf32, #tpu.memory_space<vmem>>, vector<1x128xf32>
    tpu.vector_store %arg13[%c0_58, %c0_59], %116 {strides = array<i32>} : memref<1x128xf32, #tpu.memory_space<vmem>>, vector<1x128xf32>,
    return
  }
  func.func @transform_0(%arg0: i32) -> (i32, i32) {
    %c0_i32 = arith.constant 0 : i32
    %c0_i32_0 = arith.constant 0 : i32
    %c0_i32_1 = arith.constant 0 : i32
    return %c0_i32, %c0_i32_0 : i32, i32
  }
  func.func @transform_1(%arg0: i32) -> (i32, i32) {
    %c0_i32 = arith.constant 0 : i32
    %c0_i32_0 = arith.constant 0 : i32
    %c0_i32_1 = arith.constant 0 : i32
    return %c0_i32, %c0_i32_0 : i32, i32
  }
  func.func @transform_2(%arg0: i32) -> (i32, i32) {
    %c0_i32 = arith.constant 0 : i32
    %c0_i32_0 = arith.constant 0 : i32
    %c0_i32_1 = arith.constant 0 : i32
    return %c0_i32, %c0_i32_0 : i32, i32
  }
  func.func @transform_3(%arg0: i32) -> (i32, i32) {
    %c0_i32 = arith.constant 0 : i32
    %c0_i32_0 = arith.constant 0 : i32
    %c0_i32_1 = arith.constant 0 : i32
    return %c0_i32, %c0_i32_0 : i32, i32
  }
  func.func @transform_4(%arg0: i32) -> (i32, i32) {
    %c0_i32 = arith.constant 0 : i32
    %c0_i32_0 = arith.constant 0 : i32
    %c0_i32_1 = arith.constant 0 : i32
    return %c0_i32, %c0_i32_0 : i32, i32
  }
  func.func @transform_5(%arg0: i32) -> (i32, i32) {
    %c0_i32 = arith.constant 0 : i32
    %c0_i32_0 = arith.constant 0 : i32
    %c0_i32_1 = arith.constant 0 : i32
    return %c0_i32, %c0_i32_0 : i32, i32
  }
  func.func @transform_6(%arg0: i32) -> (i32, i32) {
    %c0_i32 = arith.constant 0 : i32
    %c0_i32_0 = arith.constant 0 : i32
    %c0_i32_1 = arith.constant 0 : i32
    return %c0_i32, %c0_i32_0 : i32, i32
  }
  func.func @transform_7(%arg0: i32) -> (i32, i32) {
    %c0_i32 = arith.constant 0 : i32
    %c0_i32_0 = arith.constant 0 : i32
    %c0_i32_1 = arith.constant 0 : i32
    return %c0_i32, %c0_i32_0 : i32, i32
  }
  func.func @transform_8(%arg0: i32) -> (i32, i32) {
    %c0_i32 = arith.constant 0 : i32
    %c0_i32_0 = arith.constant 0 : i32
    %c0_i32_1 = arith.constant 0 : i32
    return %c0_i32, %c0_i32_0 : i32, i32
  }
  func.func @transform_9(%arg0: i32) -> (i32, i32) {
    %c0_i32 = arith.constant 0 : i32
    %c0_i32_0 = arith.constant 0 : i32
    %c0_i32_1 = arith.constant 0 : i32
    return %c0_i32, %c0_i32_0 : i32, i32
  }
  func.func @transform_10(%arg0: i32) -> (i32, i32) {
    %c0_i32 = arith.constant 0 : i32
    %c0_i32_0 = arith.constant 0 : i32
    %c0_i32_1 = arith.constant 0 : i32
    return %c0_i32, %c0_i32_0 : i32, i32
  }
  func.func @transform_11(%arg0: i32) -> (i32, i32) {
    %c0_i32 = arith.constant 0 : i32
    %c0_i32_0 = arith.constant 0 : i32
    %c0_i32_1 = arith.constant 0 : i32
    return %c0_i32, %c0_i32_0 : i32, i32
  }
  func.func @transform_12(%arg0: i32) -> (i32, i32) {
    %c0_i32 = arith.constant 0 : i32
    %c0_i32_0 = arith.constant 0 : i32
    %c0_i32_1 = arith.constant 0 : i32
    return %c0_i32, %c0_i32_0 : i32, i32
  }
}

</mosaic_0001>

<bundles_post_ra>
// kernel: tpu_custom_call.1
= control target key start
LH: loop header
LB: loop body
LE: loop exit
PB: predicated region body
PF: predicated region fallthrough
CT: control target
= control target key end

     0   :  { %18 = vsyncpa [#allocation3], 0  ;;  %s1663_s0 = inlined_call_operand.vmem [shape: f32[24,6], index: 0, kind: input, shape index: {}]   ;;  %s1664_s1 = inlined_call_operand.vmem [shape: f32[128,6], index: 1, kind: input, shape index: {}]   ;;  %s1665_s2 = inlined_call_operand.vmem [shape: f32[24,1], index: 2, kind: input, shape index: {}]   ;;  %s1666_s3 = inlined_call_operand.vmem [shape: f32[1,128], index: 3, kind: input, shape index: {}]   ;;  %s1667_s4 = inlined_call_operand.vmem [shape: f32[24,1], index: 4, kind: input, shape index: {}]   ;;  %s1668_s5 = inlined_call_operand.vmem [shape: f32[1,128], index: 5, kind: input, shape index: {}]   ;;  %s1669_s6 = inlined_call_operand.vmem [shape: f32[24,1], index: 6, kind: input, shape index: {}]   ;;  %s1670_s7 = inlined_call_operand.vmem [shape: f32[1,128], index: 7, kind: input, shape index: {}]   ;;  %s1671_s8 = inlined_call_operand.vmem [shape: f32[24,1], index: 8, kind: input, shape index: {}]   ;;  %s1672_s9 = inlined_call_operand.vmem [shape: f32[1,128], index: 9, kind: input, shape index: {}]   ;;  %s1673_s10 = inlined_call_operand.vmem [shape: f32[24,1], index: 10, kind: output, shape index: {0}]   ;;  %s1674_s11 = inlined_call_operand.hbm [shape: f32[1,128], index: 11, kind: output, shape index: {1}]   ;;  %s1675_s12 = inlined_call_operand.hbm [shape: f32[1,128], index: 12, kind: output, shape index: {2}]  }
   0x1   :  { %19 = vsyncpa [#allocation5], 0  ;;  %v58_v0 = vld [vmem:[%s1664_s1 + $0x78] sm:$0xff]  ;;  %v1187_v1 = vld [vmem:[%s1669_s6] sm:$0xff]  ;;  %vm71_vm0 = vcmask 48128   ;;  %v1111_v14 = vmov 0  }
   0x2   :  { %v1192_v2 = vld [vmem:[%s1669_s6 + $0x8] sm:$0xff]  ;;  %v1197_v3 = vld [vmem:[%s1669_s6 + $0x10] sm:$0xff]  ;;  %v1202_v4 = vld [vmem:[%s1670_s7] sm:$0x1]  ;;  %742 = vmatpush.xpose.msk.msra.mxu0 %vm71_vm0, %v58_v0  ;;  %774 = vmatpush.xpose.msk.msra.mxu1 %vm71_vm0, %v58_v0  ;;  %vm191_vm1 = vcmask 1040384  }
   0x3   :  { %v1209_v5 = vld [vmem:[%s1671_s8] sm:$0xff]  ;;  %v1214_v6 = vld [vmem:[%s1671_s8 + $0x8] sm:$0xff]  ;;  %v1219_v7 = vld [vmem:[%s1671_s8 + $0x10] sm:$0xff]  ;;  %775 = vmatpush.xpose.msk.msra.mxu2 %vm71_vm0, %v58_v0  ;;  %899 = vset.pattern.permute.xlu0 %v1111_v14 }
   0x4   :  { %v57_v8 = vld [vmem:[%s1664_s1 + $0x70] sm:$0xff]  ;;  %v56_v9 = vld [vmem:[%s1664_s1 + $0x68] sm:$0xff]  ;;  %v55_v10 = vld [vmem:[%s1664_s1 + $0x60] sm:$0xff]  ;;  %900 = vset.pattern.permute.xlu1 %v1111_v14  ;;  %901 = vset.pattern.permute.xlu2 %v1111_v14 }
   0x5   :  { %v54_v11 = vld [vmem:[%s1664_s1 + $0x58] sm:$0xff]  ;;  %v53_v12 = vld [vmem:[%s1664_s1 + $0x50] sm:$0xff]  ;;  %v52_v13 = vld [vmem:[%s1664_s1 + $0x48] sm:$0xff] }
   0x6   :  { %743 = vmatpush.xpose.msk.msra.mxu0 %vm71_vm0, %v57_v8  ;;  %776 = vmatpush.xpose.msk.msra.mxu1 %vm71_vm0, %v57_v8  ;;  %v51_v15 = vld [vmem:[%s1664_s1 + $0x40] sm:$0xff]  ;;  %v50_v17 = vld [vmem:[%s1664_s1 + $0x38] sm:$0xff]  ;;  %v156_v18 = vld [vmem:[%s1665_s2 + $0x8] sm:$0xff] }
   0x7   :  { %777 = vmatpush.xpose.msk.msra.mxu2 %vm71_vm0, %v57_v8  ;;  %v155_v16 = vld [vmem:[%s1665_s2] sm:$0xff]  ;;  %v157_v19 = vld [vmem:[%s1665_s2 + $0x10] sm:$0xff]  ;;  %v1288_v21 = vld [vmem:[%s1667_s4 + $0x8] sm:$0xff] }
   0x8   :  { %161 = vperm.xlu0 %899, %v155_v16   ;;  %v49_v20 = vld [vmem:[%s1664_s1 + $0x30] sm:$0xff]  ;;  %171 = vperm.xlu1 %900, %v157_v19   ;;  %v48_v22 = vld [vmem:[%s1664_s1 + $0x28] sm:$0xff]  ;;  %v1300_v23 = vld [vmem:[%s1667_s4] sm:$0xff] }
   0x9   :  { %214 = vperm.xlu2 %901, %v1288_v21   ;;  %v47_v24 = vld [vmem:[%s1664_s1 + $0x20] sm:$0xff]  ;;  %v1314_v25 = vld [vmem:[%s1667_s4 + $0x10] sm:$0xff]  ;;  %v46_v26 = vld [vmem:[%s1664_s1 + $0x18] sm:$0xff] }
   0xa   :  { %744 = vmatpush.xpose.msk.msra.mxu0 %vm71_vm0, %v56_v9  ;;  %778 = vmatpush.xpose.msk.msra.mxu1 %vm71_vm0, %v56_v9  ;;  %v45_v27 = vld [vmem:[%s1664_s1 + $0x10] sm:$0xff]  ;;  %v44_v28 = vld [vmem:[%s1664_s1 + $0x8] sm:$0xff]  ;;  %v43_v29 = vld [vmem:[%s1664_s1] sm:$0xff] }
   0xb   :  { %779 = vmatpush.xpose.msk.msra.mxu2 %vm71_vm0, %v56_v9  ;;  %v40_v30 = vld [vmem:[%s1663_s0] sm:$0xff]  ;;  %v41_v31 = vld [vmem:[%s1663_s0 + $0x8] sm:$0xff]  ;;  %v42_v32 = vld [vmem:[%s1663_s0 + $0x10] sm:$0xff] }
   0xc   :  { %v1354_v33 = vld [vmem:[%s1668_s5] sm:$0x1] }
   0xd   :  { %v189_v34 = vand.u32 2147483647, %v1354_v33  ;;  %v1363_v35 = vld [vmem:[%s1672_s9] sm:$0x1] }
   0xe   :  { %745 = vmatpush.xpose.msk.msra.mxu0 %vm71_vm0, %v55_v10  ;;  %780 = vmatpush.xpose.msk.msra.mxu1 %vm71_vm0, %v55_v10  ;;  %v902_v39 = vld [vmem:[%s1666_s3] ss:$0 sm:$0xff]  ;;  %s1420_s3 = smov 0  }
   0xf   :  { %781 = vmatpush.xpose.msk.msra.mxu2 %vm71_vm0, %v55_v10  ;;  %v190_v36 = vmul.f32 %v189_v34, %v1363_v35  ;;  %v1404_v34 = vmov 0.0  }
  0x10   :  { %166 = vperm.xlu0 %899, %v156_v18   ;;  %209 = vperm.xlu1 %900, %v1300_v23  }
  0x11   :  { %219 = vperm.xlu2 %901, %v1314_v25   ;;  %v192_v37 = vsel %vm191_vm1, %v190_v36, -inf  ;;  %v1406_v36 = vmov 0.0  }
  0x12   :  { %746 = vmatpush.xpose.msk.msra.mxu0 %vm71_vm0, %v54_v11  ;;  %782 = vmatpush.xpose.msk.msra.mxu1 %vm71_vm0, %v54_v11 }
  0x13   :  { %783 = vmatpush.xpose.msk.msra.mxu2 %vm71_vm0, %v54_v11 }
  0x16   :  { %747 = vmatpush.xpose.msk.msra.mxu0 %vm71_vm0, %v53_v12  ;;  %784 = vmatpush.xpose.msk.msra.mxu1 %vm71_vm0, %v53_v12 }
  0x17   :  { %785 = vmatpush.xpose.msk.msra.mxu2 %vm71_vm0, %v53_v12 }
  0x1a   :  { %748 = vmatpush.xpose.msk.msra.mxu0 %vm71_vm0, %v52_v13  ;;  %786 = vmatpush.xpose.msk.msra.mxu1 %vm71_vm0, %v52_v13 }
  0x1b   :  { %787 = vmatpush.xpose.msk.msra.mxu2 %vm71_vm0, %v52_v13 }
  0x1e   :  { %749 = vmatpush.xpose.msk.msra.mxu0 %vm71_vm0, %v51_v15  ;;  %788 = vmatpush.xpose.msk.msra.mxu1 %vm71_vm0, %v51_v15 }
  0x1f   :  { %789 = vmatpush.xpose.msk.msra.mxu2 %vm71_vm0, %v51_v15 }
  0x22   :  { %750 = vmatpush.xpose.msk.msra.mxu0 %vm71_vm0, %v50_v17  ;;  %790 = vmatpush.xpose.msk.msra.mxu1 %vm71_vm0, %v50_v17 }
  0x23   :  { %791 = vmatpush.xpose.msk.msra.mxu2 %vm71_vm0, %v50_v17 }
  0x26   :  { %751 = vmatpush.xpose.msk.msra.mxu0 %vm71_vm0, %v49_v20  ;;  %792 = vmatpush.xpose.msk.msra.mxu1 %vm71_vm0, %v49_v20 }
  0x27   :  { %793 = vmatpush.xpose.msk.msra.mxu2 %vm71_vm0, %v49_v20 }
  0x2a   :  { %752 = vmatpush.xpose.msk.msra.mxu0 %vm71_vm0, %v48_v22  ;;  %794 = vmatpush.xpose.msk.msra.mxu1 %vm71_vm0, %v48_v22 }
  0x2b   :  { %795 = vmatpush.xpose.msk.msra.mxu2 %vm71_vm0, %v48_v22 }
  0x2e   :  { %753 = vmatpush.xpose.msk.msra.mxu0 %vm71_vm0, %v47_v24  ;;  %796 = vmatpush.xpose.msk.msra.mxu1 %vm71_vm0, %v47_v24 }
  0x2f   :  { %797 = vmatpush.xpose.msk.msra.mxu2 %vm71_vm0, %v47_v24 }
  0x32   :  { %754 = vmatpush.xpose.msk.msra.mxu0 %vm71_vm0, %v46_v26  ;;  %798 = vmatpush.xpose.msk.msra.mxu1 %vm71_vm0, %v46_v26 }
  0x33   :  { %799 = vmatpush.xpose.msk.msra.mxu2 %vm71_vm0, %v46_v26 }
  0x36   :  { %755 = vmatpush.xpose.msk.msra.mxu0 %vm71_vm0, %v45_v27  ;;  %800 = vmatpush.xpose.msk.msra.mxu1 %vm71_vm0, %v45_v27 }
  0x37   :  { %801 = vmatpush.xpose.msk.msra.mxu2 %vm71_vm0, %v45_v27 }
  0x3a   :  { %756 = vmatpush.xpose.msk.msra.mxu0 %vm71_vm0, %v44_v28  ;;  %802 = vmatpush.xpose.msk.msra.mxu1 %vm71_vm0, %v44_v28 }
  0x3b   :  { %803 = vmatpush.xpose.msk.msra.mxu2 %vm71_vm0, %v44_v28  ;;  %193 = vmax.xlane.f32.xlu0 %v192_v37  ;;  %v1408_v37 = vmov 0.0  }
  0x3e   :  { %757 = vmatpush.xpose.msk.msra.mxu0 %vm71_vm0, %v43_v29  ;;  %804 = vmatpush.xpose.msk.msra.mxu1 %vm71_vm0, %v43_v29 }
  0x3f   :  { %805 = vmatpush.xpose.msk.msra.mxu2 %vm71_vm0, %v43_v29 }
  0x41   :  { %758 = vmatmul.msk.f32.vlgmr.msra.gmra.mxu0 %vm71_vm0, %v40_v30  ;;  %759 = vmatmul.msk.f32.vlgmr.msra.gmra.mxu1 %vm71_vm0, %v41_v31 }
  0x42   :  { %760 = vmatmul.msk.f32.vlgmr.msra.gmra.mxu2 %vm71_vm0, %v42_v32  ;;  %v1402_v32 = vmov 0.0  }
  0x63   :  { %v1390_v9 = vpop.permute.xlu2 %214 }
  0x6b   :  { %v1396_v18 = vpop.permute.xlu2 %219 }
  0x7a   :  { %v162_v38 = vpop.permute.xlu0 %161  ;;  %v172_v49 = vpop.permute.xlu1 %171 }
  0x7b   :  { %v177_v43 = vadd.f32 %v902_v39, %v162_v38  ;;  %v179_v52 = vadd.f32 %v902_v39, %v172_v49  ;;  %v1410_v38 = vmov 1.0  }
  0x82   :  { %v167_v40 = vpop.permute.xlu0 %166  ;;  %v1392_v13 = vpop.permute.xlu1 %209 }
  0x83   :  { %v178_v44 = vadd.f32 %v902_v39, %v167_v40  ;;  %v1412_v39 = vmov 1.0   ;;  %v1414_v40 = vmov 1.0  }
  0xae   :  { %v1382_v62 = vpop.xlane.xlu0 %193 }
  0xbe   :  { %v146_v41 = vpop.f32.mrf.mxu0  ;;  %v149_v42 = vpop.f32.mrf.mxu1 }
  0xbf   :  { %v180_v45 = vmul.f32 2.0, %v146_v41  ;;  %v181_v46 = vmul.f32 2.0, %v149_v42  ;;  %v1416_v41 = vmov 1.0   ;;  %v1418_v42 = vmov 0  }
  0xc1   :  { %v183_v47 = vsub.f32 %v177_v43, %v180_v45  ;;  %v184_v48 = vsub.f32 %v178_v44, %v181_v46 }
  0xc3   :  { %v1370_v50 = vmax.f32 %v183_v47, 0.0  ;;  %v1372_v51 = vmax.f32 %v184_v48, 0.0 }
  0xc5   :  { %v1375_v53 = vsub.f32 0.0, %v1370_v50  ;;  %v1378_v54 = vsub.f32 0.0, %v1372_v51  ;;  %v152_v55 = vpop.f32.mrf.mxu2 }
  0xc6   :  { %v182_v56 = vmul.f32 2.0, %v152_v55 }
  0xc7   :  { %v761_v57 = vadd.f32 -3.4341896, %v1375_v53  ;;  %v762_v58 = vadd.f32 -3.4341896, %v1378_v54 }
  0xc8   :  { %v185_v59 = vsub.f32 %v179_v52, %v182_v56 }
  0xc9   :  { %v201_v60 = vmul.f32 1.442695, %v761_v57  ;;  %v203_v61 = vmul.f32 1.442695, %v762_v58 }
  0xca   :  { %v1384_v63 = vmax.f32 %v185_v59, 0.0 }
  0xcb   :  { %903 = vpow2.f32 %v201_v60 }
  0xcc   :  { %905 = vpow2.f32 %v203_v61  ;;  %v1387_v0 = vsub.f32 0.0, %v1384_v63 }
  0xce   :  { %v763_v8 = vadd.f32 -3.4341896, %v1387_v0 }
  0xd0   :  { %v205_v10 = vmul.f32 1.442695, %v763_v8 }
  0xd1   :  { %v904_v11 = vpop.eup %903 }
  0xd2   :  { %v906_v12 = vpop.eup %905  ;;  %907 = vpow2.f32 %v205_v10  ;;  %v222_v15 = vmul.f32 %v904_v11, %v1392_v13 }
  0xd3   :  { %v223_v16 = vmul.f32 %v906_v12, %v1390_v9 }
  0xd5   :  { %v225_v19 = vadd.f32 %v223_v16, %v222_v15 }
  0xd8   :  { %v908_v17 = vpop.eup %907 }
  0xd9   :  { %v224_v20 = vmul.f32 %v908_v17, %v1396_v18 }
  0xdb   :  { %v226_v22 = vadd.f32 %v225_v19, %v224_v20 }
  0xdd   :  { %v227_v24 = vrot.slane %v226_v22, 4 }
  0xdf   :  { %v228_v26 = vadd.f32 %v227_v24, %v226_v22 }
  0xe1   :  { %v229_v27 = vrot.slane %v228_v26, 2 }
  0xe3   :  { %v230_v28 = vadd.f32 %v229_v27, %v228_v26 }
  0xe5   :  { %v231_v29 = vrot.slane %v230_v28, 1 }
  0xe7   :  { %v232_v30 = vadd.f32 %v231_v29, %v230_v28 }
  0xe9   :  { %v233_v31 = vmul.f32 %v232_v30, %v1354_v33  }
  0xea LB: > { %v1112_v43 = vmov 0   ;;  %v269_v44 = vmul.f32 2.0, %v1085_v37  ;;  %v271_v45 = vmul.f32 2.0, %v1077_v34  ;;  %v270_v46 = vmul.f32 2.0, %v1081_v36  ;;  %s239_s3 = sadd.s32 1, %s1109_s3   ;;  %s1109_s3 = sphi %s1420_s3, %s239_s3   ;;  %v1105_v42 = vphi %v1418_v42, %v1685_v42   ;;  %v1101_v41 = vphi %v1416_v41, %v1684_v41   ;;  %v1097_v40 = vphi %v1414_v40, %v1683_v40   ;;  %v1093_v39 = vphi %v1412_v39, %v1682_v39   ;;  %v1089_v38 = vphi %v1410_v38, %v1681_v38   ;;  %v1085_v37 = vphi %v1408_v37, %v1680_v37   ;;  %v1081_v36 = vphi %v1406_v36, %v1679_v36   ;;  %v1077_v34 = vphi %v1404_v34, %v1678_v34   ;;  %v1073_v32 = vphi %v1402_v32, %v1677_v32   ;;  %v1069_v31 = vphi %v233_v31, %v491_v31  }
  0xeb   : > { %909 = vset.pattern.permute.xlu0 %v1112_v43  ;;  %910 = vset.pattern.permute.xlu1 %v1112_v43  ;;  %vm251_vm2 = vcmp.gt.f32.partialorder %v1363_v35, 0.0  ;;  %v290_v59 = vmul.f32 2.0, %v1073_v32  ;;  %vm323_vm7 = vcmp.gt.f32.partialorder %v1209_v5, 0.0  ;;  %vm324_vm8 = vcmp.gt.f32.partialorder %v1214_v6, 0.0  ;;  %p236_p0 = scmp.ge.s32.totalorder %s239_s3, 80  }
  0xec   : > { %911 = vset.pattern.permute.xlu2 %v1112_v43  ;;  %274 = vperm.xlu0 %909, %v269_v44   ;;  %v252_v47 = vsel %vm251_vm2, %v1069_v31, 1.0  ;;  %vm325_vm10 = vcmp.gt.f32.partialorder %v1219_v7, 0.0  ;;  %s1114_s9 = smov (%p236_p0), [#allocation2]   ;;  %s680_s25 = sshll.u32 (%p236_p0), %s1674_s11, 4  ;;  %s681_s25 = int_to_ptr.hbm [resolvable:$true] %s680_s25 }
  0xed   : > { %284 = vperm.xlu1 %910, %v271_v45   ;;  %912 = vrcp.f32 %v252_v47  ;;  %vm258_vm3 = vweird.f32 %v252_v47  ;;  %v264_v56 = vand.u32 2147483648, %v252_v47  ;;  %v262_v58 = vand.u32 2147483647, %v252_v47  ;;  %s678_s22 = sshll.u32 (%p236_p0), %s1114_s9, 4  ;;  %s691_s15 = sshll.u32 (%p236_p0), %s1675_s12, 4  ;;  %s679_s22 = int_to_ptr.vmem [resolvable:$true] %s678_s22  ;;  %s692_s15 = int_to_ptr.hbm [resolvable:$true] %s691_s15 }
  0xee   : > { %v291_v8 = vperm.slane %v290_v59, 0 }
  0xef   : > { %v265_v60 = vor.u32 1.1754944e-38, %v264_v56  ;;  %vm263_vm6 = vcmp.eq.f32.partialorder %v262_v58, 8.507059e+37 }
  0xf3   : > { %v913_v48 = vpop.eup %912 }
  0xf4   : > { %279 = vperm.xlu0 %909, %v270_v46   ;;  %v254_v49 = vmul.f32 %v913_v48, %v252_v47  ;;  %vm259_vm4 = vweird.f32 %v913_v48 }
  0xf5   : > { %vm260_vm5 = vmor %vm258_vm3, %vm259_vm4 }
  0xf6   : > { %v255_v52 = vsub.f32 1.0, %v254_v49 }
  0xf8   : > { %v256_v55 = vmul.f32 %v913_v48, %v255_v52 }
  0xfa   : > { %v257_v57 = vadd.f32 %v913_v48, %v256_v55 }
  0xfc   : > { %v261_v61 = vsel %vm260_vm5, %v913_v48, %v257_v57 }
  0xfd   : > { %v266_v12 = vsel %vm263_vm6, %v265_v60, %v261_v61 }
  0xfe   : > { %v267_v19 = vmul.f32 %v266_v12, %v1354_v33 }
 0x100   : > { %v1471_v26 = vsel %vm251_vm2, %v267_v19, 1.0 }
 0x101   : > { %v307_v30 = vmul.f32 %v1471_v26, %v1354_v33 }
 0x103   : > { %v309_v47 = vperm.slane %v307_v30, 0 }
 0x15e   : > { %v275_v10 = vpop.permute.xlu0 %274 }
 0x15f   : > { %v285_v11 = vpop.permute.xlu1 %284  ;;  %v287_v15 = vadd.f32 %v275_v10, %v1370_v50 }
 0x160   : > { %v289_v17 = vadd.f32 %v285_v11, %v1384_v63 }
 0x161   : > { %v292_v16 = vadd.f32 %v291_v8, %v287_v15 }
 0x162   : > { %v294_v24 = vadd.f32 %v291_v8, %v289_v17 }
 0x163   : > { %v295_v20 = vsub.f32 0.0, %v292_v16 }
 0x164   : > { %v297_v45 = vsub.f32 0.0, %v294_v24 }
 0x165   : > { %v764_v22 = vadd.f32 -3.4341896, %v295_v20 }
 0x166   : > { %v280_v27 = vpop.permute.xlu0 %279  ;;  %v766_v49 = vadd.f32 -3.4341896, %v297_v45 }
 0x167   : > { %v301_v28 = vmul.f32 1.442695, %v764_v22  ;;  %v288_v29 = vadd.f32 %v280_v27, %v1372_v51 }
 0x168   : > { %v305_v57 = vmul.f32 1.442695, %v766_v49 }
 0x169   : > { %914 = vpow2.f32 %v301_v28  ;;  %v293_v44 = vadd.f32 %v291_v8, %v288_v29 }
 0x16b   : > { %v296_v46 = vsub.f32 0.0, %v293_v44 }
 0x16d   : > { %v765_v48 = vadd.f32 -3.4341896, %v296_v46 }
 0x16f   : > { %v1476_v52 = vpop.eup %914  ;;  %v303_v55 = vmul.f32 1.442695, %v765_v48 }
 0x170   : > { %v311_v56 = vmul.f32 %v1476_v52, %v309_v47 }
 0x171   : > { %916 = vpow2.f32 %v303_v55 }
 0x172   : > { %314 = vadd.xlane.f32.xlu1 %v311_v56  ;;  %918 = vpow2.f32 %v305_v57 }
 0x177   : > { %v1479_v58 = vpop.eup %916 }
 0x178   : > { %v312_v59 = vmul.f32 %v1479_v58, %v309_v47  ;;  %v1482_v60 = vpop.eup %918 }
 0x179   : > { %v313_v61 = vmul.f32 %v1482_v60, %v309_v47 }
 0x17a   : > { %316 = vadd.xlane.f32.xlu2 %v312_v59 }
 0x182   : > { %318 = vadd.xlane.f32.xlu2 %v313_v61 }
 0x1e5   : > { %v315_v8 = vpop.xlane.xlu1 %314 }
 0x1e6   : > { %v320_v10 = vmul.f32 %v315_v8, %v1300_v23 }
 0x1e8   : > { %v326_v11 = vsel %vm323_vm7, %v320_v10, 1.0 }
 0x1e9   : > { %920 = vrcp.f32 %v326_v11  ;;  %v340_v22 = vand.u32 2147483648, %v326_v11  ;;  %v338_v27 = vand.u32 2147483647, %v326_v11  ;;  %vm334_vm11 = vweird.f32 %v326_v11 }
 0x1eb   : > { %v341_v45 = vor.u32 1.1754944e-38, %v340_v22  ;;  %vm339_vm13 = vcmp.eq.f32.partialorder %v338_v27, 8.507059e+37 }
 0x1ed   : > { %v317_v12 = vpop.xlane.xlu2 %316 }
 0x1ee   : > { %v321_v15 = vmul.f32 %v317_v12, %v1288_v21 }
 0x1ef   : > { %v921_v16 = vpop.eup %920 }
 0x1f0   : > { %v330_v17 = vmul.f32 %v921_v16, %v326_v11  ;;  %v327_v19 = vsel %vm324_vm8, %v321_v15, 1.0  ;;  %vm335_vm9 = vweird.f32 %v921_v16 }
 0x1f1   : > { %922 = vrcp.f32 %v327_v19  ;;  %vm336_vm12 = vmor %vm334_vm11, %vm335_vm9  ;;  %v355_v57 = vand.u32 2147483648, %v327_v19  ;;  %v353_v8 = vand.u32 2147483647, %v327_v19  ;;  %vm349_vm15 = vweird.f32 %v327_v19 }
 0x1f2   : > { %v331_v20 = vsub.f32 1.0, %v330_v17 }
 0x1f3   : > { %v356_v15 = vor.u32 1.1754944e-38, %v355_v57  ;;  %vm354_vm2 = vcmp.eq.f32.partialorder %v353_v8, 8.507059e+37  ;;  %v436_v57 = vand.u32 2147483647, %v1471_v26 }
 0x1f4   : > { %v332_v24 = vmul.f32 %v921_v16, %v331_v20 }
 0x1f5   : > { %v319_v28 = vpop.xlane.xlu2 %318 }
 0x1f6   : > { %v333_v29 = vadd.f32 %v921_v16, %v332_v24  ;;  %v322_v30 = vmul.f32 %v319_v28, %v1314_v25 }
 0x1f7   : > { %v923_v44 = vpop.eup %922 }
 0x1f8   : > { %v337_v46 = vsel %vm336_vm12, %v921_v16, %v333_v29  ;;  %v345_v47 = vmul.f32 %v923_v44, %v327_v19  ;;  %v328_v48 = vsel %vm325_vm10, %v322_v30, 1.0  ;;  %vm350_vm14 = vweird.f32 %v923_v44 }
 0x1f9   : > { %v342_v49 = vsel %vm339_vm13, %v341_v45, %v337_v46  ;;  %924 = vrcp.f32 %v328_v48  ;;  %vm351_vm0 = vmor %vm349_vm15, %vm350_vm14  ;;  %v370_v27 = vand.u32 2147483648, %v328_v48  ;;  %v368_v30 = vand.u32 2147483647, %v328_v48 }
 0x1fa   : > { %v343_v55 = vmul.f32 %v342_v49, %v1300_v23  ;;  %v346_v56 = vsub.f32 1.0, %v345_v47  ;;  %vm364_vm4 = vweird.f32 %v328_v48  ;;  %vm1113_vm13 = vmmov 1  }
 0x1fb   : > { %vm369_vm6 = vcmp.eq.f32.partialorder %v368_v30, 8.507059e+37 }
 0x1fc   : > { %v1500_v59 = vsel %vm323_vm7, %v343_v55, 1.0  ;;  %v347_v61 = vmul.f32 %v923_v44, %v346_v56  ;;  %vm424_vm7 = vcmask 7168  }
 0x1fd   : > { %v377_v10 = vmul.f32 %v1500_v59, %v1300_v23  ;;  %926 = vlog2.f32 %v1500_v59 }
 0x1fe   : > { %v348_v11 = vadd.f32 %v923_v44, %v347_v61 }
 0x1ff   : > { %v925_v12 = vpop.eup %924  ;;  %382 = vperm.xlu0 %909, %v377_v10  }
 0x200   : > { %v352_v16 = vsel %vm351_vm0, %v923_v44, %v348_v11  ;;  %v360_v17 = vmul.f32 %v925_v12, %v328_v48  ;;  %vm365_vm3 = vweird.f32 %v925_v12  ;;  %v371_v44 = vor.u32 1.1754944e-38, %v370_v27 }
 0x201   : > { %v357_v20 = vsel %vm354_vm2, %v356_v15, %v352_v16  ;;  %vm366_vm5 = vmor %vm364_vm4, %vm365_vm3  ;;  %v437_v48 = vmul.f32 %v436_v57, %v1363_v35 }
 0x202   : > { %v358_v22 = vmul.f32 %v357_v20, %v1288_v21  ;;  %v361_v24 = vsub.f32 1.0, %v360_v17 }
 0x203   : > { %v438_v61 = vsel %vm191_vm1, %v437_v48, -inf }
 0x204   : > { %v1507_v28 = vsel %vm324_vm8, %v358_v22, 1.0  ;;  %v362_v29 = vmul.f32 %v925_v12, %v361_v24  ;;  %vm250_vm8 = vcmp.eq.s32.totalorder %v1105_v42, 0 }
 0x205   : > { %v378_v19 = vmul.f32 %v1507_v28, %v1288_v21  ;;  %928 = vlog2.f32 %v1507_v28 }
 0x206   : > { %v363_v45 = vadd.f32 %v925_v12, %v362_v29 }
 0x207   : > { %387 = vperm.xlu2 %911, %v378_v19  }
 0x208   : > { %v367_v46 = vsel %vm366_vm5, %v925_v12, %v363_v45 }
 0x209   : > { %v372_v47 = vsel %vm369_vm6, %v371_v44, %v367_v46 }
 0x20a   : > { %v373_v49 = vmul.f32 %v372_v47, %v1314_v25  ;;  %v419_v47 = vand.u32 2147483647, %v1507_v28 }
 0x20c   : > { %v1514_v55 = vsel %vm325_vm10, %v373_v49, 1.0  ;;  %v418_v49 = vand.u32 2147483647, %v1500_v59  ;;  %v422_v57 = vmul.f32 %v419_v47, %v1214_v6 }
 0x20d   : > { %v379_v56 = vmul.f32 %v1514_v55, %v1314_v25  ;;  %930 = vlog2.f32 %v1514_v55 }
 0x20e   : > { %v421_v48 = vmul.f32 %v418_v49, %v1209_v5  ;;  %932 = vlog2.f32 %v1471_v26 }
 0x20f   : > { %392 = vperm.xlu0 %909, %v379_v56   ;;  %v420_v56 = vand.u32 2147483647, %v1514_v55  ;;  %935 = vset.pattern.permute.xlu2 (%p236_p0), %v1111_v14 }
 0x217   :  { %936 = vset.pattern.permute.xlu0 (%p236_p0), %v1111_v14 }
 0x230   : > { %439 = vmax.xlane.f32.xlu2 %v438_v61  ;;  %v423_v61 = vmul.f32 %v420_v56, %v1219_v7  ;;  %v479_v56 = vsel %vm250_vm8, 1, %v1112_v43 }
 0x261   : > { %v388_v10 = vpop.permute.xlu2 %387 }
 0x262   : > { %v396_v12 = vmul.f32 %v1479_v58, %v388_v10  ;;  %v425_v10 = vsel %vm424_vm7, %v421_v48, -inf }
 0x271   : > { %v383_v8 = vpop.permute.xlu0 %382 }
 0x272   : > { %v395_v11 = vmul.f32 %v1476_v52, %v383_v8  ;;  %v426_v8 = vsel %vm424_vm7, %v422_v57, -inf }
 0x274   : > { %v398_v16 = vadd.f32 %v396_v12, %v395_v11  ;;  %v427_v11 = vsel %vm424_vm7, %v423_v61, -inf  ;;  %v428_v12 = vmax.f32 %v425_v10, %v426_v8  ;;  %v480_v10 = vperm.slane %v479_v56, 0 }
 0x276   : > { %vm481_vm0 = vcmp.eq.s32.totalorder %v480_v10, 1 }
 0x281   : > { %v393_v15 = vpop.permute.xlu0 %392 }
 0x282   : > { %v397_v17 = vmul.f32 %v1482_v60, %v393_v15  ;;  %v429_v15 = vmax.f32 %v428_v12, %v427_v11 }
 0x284   : > { %v399_v20 = vadd.f32 %v398_v16, %v397_v17  ;;  %v430_v16 = vrot.slane %v429_v15, 4 }
 0x286   : > { %v400_v22 = vrot.slane %v399_v20, 4  ;;  %v431_v17 = vmax.f32 %v429_v15, %v430_v16 }
 0x288   : > { %v401_v24 = vadd.f32 %v400_v22, %v399_v20  ;;  %v432_v20 = vrot.slane %v431_v17, 2 }
 0x28a   : > { %v402_v27 = vrot.slane %v401_v24, 2  ;;  %v433_v22 = vmax.f32 %v431_v17, %v432_v20 }
 0x28c   : > { %v403_v29 = vadd.f32 %v402_v27, %v401_v24  ;;  %v434_v24 = vrot.slane %v433_v22, 1  ;;  %v927_v27 = vpop.eup %926 }
 0x28e   : > { %v404_v30 = vrot.slane %v403_v29, 1 }
 0x290   : > { %v405_v19 = vadd.f32 %v404_v30, %v403_v29  ;;  %v929_v29 = vpop.eup %928 }
 0x291   : > { %v931_v30 = vpop.eup %930 }
 0x292   : > { %v1525_v45 = vmul.f32 %v405_v19, %v1354_v33  ;;  %v450_v47 = vmul.f32 0.6931472, %v931_v30 }
 0x294   : > { %v1529_v44 = vmul.f32 %v1525_v45, %v1471_v26  ;;  %v453_v8 = vmul.f32 0.5, %v450_v47 }
 0x296   : > { %v408_v52 = vsub.f32 %v1529_v44, %v1354_v33 }
 0x298   : > { %v409_v58 = vand.u32 2147483647, %v408_v52  ;;  %v435_v52 = vmax.f32 %v433_v22, %v434_v24  ;;  %v456_v22 = vsub.f32 %v1077_v34, %v453_v8 }
 0x29a   : > { %v410_v60 = vmul.f32 %v409_v58, %v1363_v35  ;;  %v415_v58 = vmul.f32 0.0001, %v1382_v62 }
 0x29c   : > { %v411_v46 = vsel %vm191_vm1, %v410_v60, -inf  ;;  %v446_v60 = vmul.f32 0.6931472, %v927_v27 }
 0x29d   : > { %412 = vmax.xlane.f32.xlu0 %v411_v46  ;;  %v448_v46 = vmul.f32 0.6931472, %v929_v29 }
 0x29e   : > { %v451_v48 = vmul.f32 0.5, %v446_v60 }
 0x29f   : > { %v452_v61 = vmul.f32 0.5, %v448_v46 }
 0x2a0   : > { %v454_v16 = vsub.f32 %v1085_v37, %v451_v48 }
 0x2a1   : > { %v455_v20 = vsub.f32 %v1081_v36, %v452_v61 }
 0x2a3   : > { %v440_v19 = vpop.xlane.xlu2 %439 }
 0x2a4   : > { %v441_v49 = vmax.f32 %v435_v52, %v440_v19 }
 0x2a6   : > { %vm442_vm12 = vcmp.gt.f32.partialorder %v441_v49, 100.0 }
 0x310   : > { %v413_v57 = vpop.xlane.xlu0 %412 }
 0x311   : > { %vm414_vm9 = vcmp.lt.f32.partialorder %v413_v57, 0.0001  ;;  %vm416_vm10 = vcmp.lt.f32.partialorder %v413_v57, %v415_v58 }
 0x312   : > { %vm417_vm11 = vmor %vm414_vm9, %vm416_vm10 }
 0x313   : > { %vm443_vm14 = vmxor %vm417_vm11, %vm1113_vm13  ;;  %v477_v11 = vsel %vm417_vm11, 1, %v1105_v42 }
 0x314   : > { %v478_v12 = vsel %vm250_vm8, %v477_v11, %v1105_v42   ;;  %vm444_vm15 = vmand %vm442_vm12, %vm443_vm14 }
 0x315   : > { %v457_v15 = vsel %vm444_vm15, 1, %v1112_v43  ;;  %v1685_v42 = vmov %v478_v12 }
 0x316   : > { %468 = vperm.xlu1 %910, %v457_v15   ;;  %v458_v17 = vperm.slane %v457_v15, 0 }
 0x318   : > { %vm459_vm2 = vcmp.eq.s32.totalorder %v458_v17, 1 }
 0x319   : > { %v460_v24 = vsel %vm459_vm2, %v454_v16, %v1085_v37  ;;  %v461_v27 = vsel %vm459_vm2, %v455_v20, %v1081_v36  ;;  %v462_v29 = vsel %vm459_vm2, %v456_v22, %v1077_v34  ;;  %v473_v30 = vsel %vm459_vm2, 1.0, %v1500_v59  ;;  %v933_v59 = vpop.eup %932 }
 0x31a   : > { %v474_v43 = vsel %vm459_vm2, 1.0, %v1507_v28  ;;  %v475_v19 = vsel %vm459_vm2, 1.0, %v1514_v55  ;;  %v482_v52 = vsel %vm481_vm0, %v473_v30, %v1101_v41   ;;  %v1568_v37 = vsel %vm481_vm0, %v460_v24, %v1085_v37  }
 0x31b   : > { %v1676_v58 = vmov %v1568_v37  ;;  %v483_v60 = vsel %vm481_vm0, %v474_v43, %v1097_v40   ;;  %v484_v46 = vsel %vm481_vm0, %v475_v19, %v1093_v39   ;;  %v488_v47 = vsel %vm481_vm0, %v461_v27, %v1081_v36  }
 0x31c   : > { %v489_v49 = vsel %vm481_vm0, %v462_v29, %v1077_v34   ;;  %v464_v56 = vmul.f32 0.6931472, %v933_v59  ;;  %v1679_v36 = vmov %v488_v47  ;;  %v1683_v40 = vmov %v483_v60 }
 0x31d   : > { %v1678_v34 = vmov %v489_v49  ;;  %v514_v16 = vperm.slane (%p236_p0), %v1202_v4, 0 }
 0x31e   : > { %v465_v28 = vmul.f32 0.5, %v464_v56  ;;  %934 = vset.pattern.permute.xlu1 (%p236_p0), %v1111_v14 }
 0x320   : > { %v466_v55 = vsub.f32 %v1073_v32, %v465_v28 }
 0x388   : > { %v469_v57 = vpop.permute.xlu1 %468  ;;  %238 = sbr.rel (!%p236_p0) target bundleno = 234 (0xea), region = 83 }
 0x389   : > { %vm470_vm3 = vcmp.eq.s32.totalorder %v469_v57, 1 }
 0x38a   : > { %v471_v41 = vsel %vm470_vm3, %v466_v55, %v1073_v32  ;;  %v472_v37 = vsel %vm470_vm3, %v1529_v44, %v1525_v45  ;;  %v476_v39 = vsel %vm470_vm3, 1.0, %v1471_v26 }
 0x38b   : > { %v486_v48 = vsel %vm250_vm8, %v476_v39, %v1089_v38   ;;  %v490_v61 = vsel %vm250_vm8, %v471_v41, %v1073_v32   ;;  %v491_v31 = vsel %vm250_vm8, %v472_v37, %v1069_v31   ;;  %v1680_v37 = vmov %v1676_v58 }
 0x38c   : > { %v1677_v32 = vmov %v490_v61  ;;  %v1681_v38 = vmov %v486_v48  ;;  %v1682_v39 = vmov %v484_v46  ;;  %v1684_v41 = vmov %v482_v52 }
 0x38d   :  { %937 = vlog2.f32 %v486_v48 }
 0x38e   :  { %939 = vlog2.f32 %v483_v60 }
 0x38f   :  { %941 = vlog2.f32 %v484_v46 }
 0x390   :  { %943 = vlog2.f32 %v482_v52 }
 0x393   :  { %v938_v42 = vpop.eup %937 }
 0x394   :  { %v505_v26 = vmul.f32 0.6931472, %v938_v42  ;;  %v940_v44 = vpop.eup %939 }
 0x395   :  { %v495_v10 = vmul.f32 0.6931472, %v940_v44  ;;  %v942_v14 = vpop.eup %941 }
 0x396   :  { %v506_v45 = vmul.f32 -0.5, %v505_v26  ;;  %v497_v33 = vmul.f32 0.6931472, %v942_v14  ;;  %v944_v34 = vpop.eup %943 }
 0x397   :  { %v499_v12 = vmul.f32 -0.5, %v495_v10  ;;  %v493_v36 = vmul.f32 0.6931472, %v944_v34 }
 0x398   :  { %v507_v8 = vadd.f32 %v506_v45, %v490_v61  ;;  %v500_v62 = vmul.f32 -0.5, %v497_v33 }
 0x399   :  { %v502_v5 = vadd.f32 %v499_v12, %v488_v47  ;;  %v498_v38 = vmul.f32 -0.5, %v493_v36 }
 0x39a   :  { %v508_v11 = vmul.f32 2.0, %v507_v8  ;;  %v503_v31 = vadd.f32 %v500_v62, %v489_v49 }
 0x39b   :  { %v562_v21 = vmul.f32 2.0, %v502_v5  ;;  %v501_v40 = vadd.f32 %v498_v38, %v1676_v58 }
 0x39c   :  { %v509_v15 = vperm.slane %v508_v11, 0  ;;  %v563_v4 = vmul.f32 2.0, %v503_v31 }
 0x39d   :  { %571 = vperm.xlu2 %935, %v562_v21   ;;  %v561_v17 = vmul.f32 2.0, %v501_v40 }
 0x39e   :  { %v512_v6 = vsub.f32 %v1387_v0, %v509_v15  ;;  %v510_v7 = vsub.f32 %v1375_v53, %v509_v15  ;;  %v511_v35 = vsub.f32 %v1378_v54, %v509_v15 }
 0x3a0   :  { %v518_v23 = vadd.f32 %v514_v16, %v512_v6  ;;  %v516_v25 = vadd.f32 %v514_v16, %v510_v7  ;;  %v517_v32 = vadd.f32 %v514_v16, %v511_v35 }
 0x3a2   :  { %523 = vmax.xlane.f32.xlu1 %v518_v23  ;;  %519 = vmax.xlane.f32.xlu0 %v516_v25 }
 0x3a5   :  { %576 = vperm.xlu2 %935, %v563_v4  }
 0x3aa   :  { %521 = vmax.xlane.f32.xlu0 %v517_v32 }
 0x3ad   :  { %589 = vperm.xlu2 %935, %v1192_v2  }
 0x3b5   :  { %594 = vperm.xlu2 %935, %v1197_v3  }
 0x3bb   :  { %566 = vperm.xlu1 %934, %v561_v17  }
 0x3be   :  { %584 = vperm.xlu0 %936, %v1187_v1  }
 0x3f7   :  { %v572_v20 = vpop.permute.xlu2 %571 }
 0x3f8   :  { %v580_v56 = vsub.f32 %v1378_v54, %v572_v20 }
 0x3ff   :  { %v577_v52 = vpop.permute.xlu2 %576 }
 0x400   :  { %v581_v28 = vsub.f32 %v1387_v0, %v577_v52 }
 0x407   :  { %v590_v49 = vpop.permute.xlu2 %589 }
 0x408   :  { %v598_v37 = vadd.f32 %v590_v49, %v580_v56 }
 0x40f   :  { %v595_v41 = vpop.permute.xlu2 %594 }
 0x410   :  { %v599_v61 = vadd.f32 %v595_v41, %v581_v28 }
 0x415   :  { %v524_v22 = vpop.xlane.xlu1 %523  ;;  %v520_v24 = vpop.xlane.xlu0 %519 }
 0x416   :  { %vm527_vm1 = vcmp.eq.f32.partialorder %v524_v22, -inf  ;;  %vm525_vm4 = vcmp.eq.f32.partialorder %v520_v24, -inf }
 0x417   :  { %v1624_v27 = vsel %vm527_vm1, 0.0, %v524_v22  ;;  %v1626_v29 = vsel %vm525_vm4, 0.0, %v520_v24 }
 0x418   :  { %v533_v30 = vsub.f32 %v518_v23, %v1624_v27  ;;  %v531_v2 = vsub.f32 %v516_v25, %v1626_v29 }
 0x41a   :  { %v538_v43 = vmul.f32 1.442695, %v533_v30  ;;  %v534_v19 = vmul.f32 1.442695, %v531_v2 }
 0x41c   :  { %945 = vpow2.f32 %v538_v43 }
 0x41d   :  { %947 = vpow2.f32 %v534_v19  ;;  %v522_v3 = vpop.xlane.xlu0 %521 }
 0x41e   :  { %vm526_vm5 = vcmp.eq.f32.partialorder %v522_v3, -inf }
 0x41f   :  { %v1630_v1 = vsel %vm526_vm5, 0.0, %v522_v3 }
 0x420   :  { %v532_v58 = vsub.f32 %v517_v32, %v1630_v1 }
 0x422   :  { %v946_v60 = vpop.eup %945  ;;  %v536_v46 = vmul.f32 1.442695, %v532_v58 }
 0x423   :  { %v948_v47 = vpop.eup %947  ;;  %544 = vadd.xlane.f32.xlu0 %v946_v60 }
 0x424   :  { %949 = vpow2.f32 %v536_v46  ;;  %540 = vadd.xlane.f32.xlu2 %v948_v47 }
 0x42a   :  { %v950_v59 = vpop.eup %949 }
 0x42b   :  { %542 = vadd.xlane.f32.xlu1 %v950_v59 }
 0x42d   :  { %v567_v55 = vpop.permute.xlu1 %566 }
 0x42e   :  { %v579_v57 = vsub.f32 %v1375_v53, %v567_v55 }
 0x430   :  { %v585_v39 = vpop.permute.xlu0 %584 }
 0x431   :  { %v597_v48 = vadd.f32 %v585_v39, %v579_v57 }
 0x433   :  { %v600_v42 = vmax.f32 %v597_v48, %v598_v37 }
 0x435   :  { %v601_v26 = vmax.f32 %v600_v42, %v599_v61 }
 0x437   :  { %v602_v45 = vrot.slane %v601_v26, 4 }
 0x439   :  { %v603_v44 = vmax.f32 %v601_v26, %v602_v45 }
 0x43b   :  { %v604_v8 = vrot.slane %v603_v44, 2 }
 0x43d   :  { %v605_v10 = vmax.f32 %v603_v44, %v604_v8 }
 0x43f   :  { %v606_v11 = vrot.slane %v605_v10, 1 }
 0x441   :  { %v607_v12 = vmax.f32 %v605_v10, %v606_v11 }
 0x443   :  { %vm608_vm6 = vcmp.eq.f32.partialorder %v607_v12, -inf }
 0x444   :  { %v609_v54 = vsel %vm608_vm6, 0.0, %v607_v12 }
 0x445   :  { %v610_v15 = vsub.f32 %v597_v48, %v609_v54  ;;  %v611_v0 = vsub.f32 %v598_v37, %v609_v54  ;;  %v612_v16 = vsub.f32 %v599_v61, %v609_v54 }
 0x447   :  { %v613_v5 = vmul.f32 1.442695, %v610_v15  ;;  %v615_v53 = vmul.f32 1.442695, %v611_v0  ;;  %v617_v6 = vmul.f32 1.442695, %v612_v16 }
 0x449   :  { %951 = vpow2.f32 %v613_v5 }
 0x44a   :  { %953 = vpow2.f32 %v615_v53 }
 0x44b   :  { %955 = vpow2.f32 %v617_v6 }
 0x44f   :  { %v952_v7 = vpop.eup %951 }
 0x450   :  { %v954_v21 = vpop.eup %953 }
 0x451   :  { %v956_v14 = vpop.eup %955  ;;  %v619_v23 = vadd.f32 %v954_v21, %v952_v7 }
 0x453   :  { %v620_v25 = vadd.f32 %v956_v14, %v619_v23 }
 0x455   :  { %v621_v33 = vrot.slane %v620_v25, 4 }
 0x457   :  { %v622_v35 = vadd.f32 %v621_v33, %v620_v25 }
 0x459   :  { %v623_v62 = vrot.slane %v622_v35, 2 }
 0x45b   :  { %v624_v31 = vadd.f32 %v623_v62, %v622_v35 }
 0x45d   :  { %v625_v32 = vrot.slane %v624_v31, 1 }
 0x45f   :  { %v626_v4 = vadd.f32 %v625_v32, %v624_v31 }
 0x461   :  { %957 = vlog2.f32 %v626_v4 }
 0x467   :  { %v958_v34 = vpop.eup %957 }
 0x468   :  { %v628_v36 = vmul.f32 0.6931472, %v958_v34 }
 0x46a   :  { %v629_v38 = vadd.f32 %v628_v36, %v609_v54 }
 0x46c   :  { %v630_v40 = vmul.f32 0.5, %v629_v38 }
 0x46e   :  { %v770_v17 = vadd.f32 -1.7170948, %v630_v40 }
 0x470   :  { %669 = vst [vmem:[#allocation2] sm:$0x1] %v770_v17  ;;  %v638_v55 = vmul.f32 2.0, %v770_v17 }
 0x471   :  { %683 = dma.vmem_to_hbm [thread:$0]  %s679_s22, 16, %s681_s25, [#allocation3]  }
 0x496   :  { %v545_v20 = vpop.xlane.xlu0 %544 }
 0x497   :  { %959 = vlog2.f32 %v545_v20  ;;  %v541_v22 = vpop.xlane.xlu2 %540 }
 0x498   :  { %961 = vlog2.f32 %v541_v22 }
 0x49d   :  { %v960_v24 = vpop.eup %959 }
 0x49e   :  { %v962_v30 = vpop.eup %961  ;;  %v551_v2 = vmul.f32 0.6931472, %v960_v24  ;;  %v543_v43 = vpop.xlane.xlu1 %542 }
 0x49f   :  { %v547_v19 = vmul.f32 0.6931472, %v962_v30  ;;  %963 = vlog2.f32 %v543_v43 }
 0x4a0   :  { %v554_v52 = vadd.f32 %v551_v2, %v1624_v27 }
 0x4a1   :  { %v552_v3 = vadd.f32 %v547_v19, %v1626_v29 }
 0x4a2   :  { %v557_v58 = vmul.f32 0.5, %v554_v52 }
 0x4a3   :  { %v555_v60 = vmul.f32 0.5, %v552_v3 }
 0x4a4   :  { %v769_v46 = vadd.f32 -1.7170948, %v557_v58 }
 0x4a5   :  { %v964_v47 = vpop.eup %963  ;;  %v767_v49 = vadd.f32 -1.7170948, %v555_v60 }
 0x4a6   :  { %v634_v59 = vmul.f32 2.0, %v769_v46  ;;  %668 = vst.msk [vmem:[%s1673_s10 + $0x10] sm:$0xff] %vm424_vm7, %v769_v46  ;;  %v549_v56 = vmul.f32 0.6931472, %v964_v47 }
 0x4a7   :  { %v632_v28 = vmul.f32 2.0, %v767_v49  ;;  %666 = vst.msk [vmem:[%s1673_s10] sm:$0xff] %vm424_vm7, %v767_v49 }
 0x4a8   :  { %v637_v27 = vadd.f32 %v634_v59, %v1384_v63  ;;  %v553_v29 = vadd.f32 %v549_v56, %v1630_v1 }
 0x4a9   :  { %v635_v57 = vadd.f32 %v632_v28, %v1370_v50 }
 0x4aa   :  { %v556_v41 = vmul.f32 0.5, %v553_v29  ;;  %v641_v37 = vadd.f32 %v638_v55, %v637_v27 }
 0x4ab   :  { %v639_v39 = vadd.f32 %v638_v55, %v635_v57 }
 0x4ac   :  { %v768_v48 = vadd.f32 -1.7170948, %v556_v41  ;;  %v644_v42 = vsub.f32 0.0, %v641_v37 }
 0x4ad   :  { %v642_v61 = vsub.f32 0.0, %v639_v39 }
 0x4ae   :  { %v633_v26 = vmul.f32 2.0, %v768_v48  ;;  %667 = vst.msk [vmem:[%s1673_s10 + $0x8] sm:$0xff] %vm424_vm7, %v768_v48  ;;  %v773_v44 = vadd.f32 -3.4341896, %v644_v42  ;;  %s1115_s10 = smov [#allocation4]  }
 0x4af   :  { %v771_v63 = vadd.f32 -3.4341896, %v642_v61  ;;  %s689_s13 = sshll.u32 %s1115_s10, 4  ;;  %s690_s13 = int_to_ptr.vmem [resolvable:$true] %s689_s13 }
 0x4b0   :  { %v636_v45 = vadd.f32 %v633_v26, %v1372_v51  ;;  %v652_v50 = vmul.f32 1.442695, %v773_v44 }
 0x4b1   :  { %v648_v10 = vmul.f32 1.442695, %v771_v63 }
 0x4b2   :  { %v640_v1 = vadd.f32 %v638_v55, %v636_v45 }
 0x4b3   :  { %965 = vpow2.f32 %v648_v10 }
 0x4b4   :  { %v643_v8 = vsub.f32 0.0, %v640_v1  ;;  %967 = vpow2.f32 %v652_v50 }
 0x4b6   :  { %v772_v11 = vadd.f32 -3.4341896, %v643_v8 }
 0x4b8   :  { %v650_v12 = vmul.f32 1.442695, %v772_v11 }
 0x4b9   :  { %v966_v54 = vpop.eup %965 }
 0x4ba   :  { %969 = vpow2.f32 %v650_v12  ;;  %v968_v15 = vpop.eup %967  ;;  %v654_v16 = vmul.f32 %v966_v54, %v1392_v13 }
 0x4bb   :  { %v656_v51 = vmul.f32 %v968_v15, %v1396_v18 }
 0x4c0   :  { %v970_v0 = vpop.eup %969 }
 0x4c1   :  { %v655_v5 = vmul.f32 %v970_v0, %v1390_v9 }
 0x4c3   :  { %v657_v53 = vadd.f32 %v655_v5, %v654_v16 }
 0x4c5   :  { %v658_v6 = vadd.f32 %v657_v53, %v656_v51 }
 0x4c7   :  { %v659_v7 = vrot.slane %v658_v6, 4 }
 0x4c9   :  { %v660_v21 = vadd.f32 %v659_v7, %v658_v6 }
 0x4cb   :  { %v661_v14 = vrot.slane %v660_v21, 2 }
 0x4cd   :  { %v662_v23 = vadd.f32 %v661_v14, %v660_v21 }
 0x4cf   :  { %v663_v25 = vrot.slane %v662_v23, 1 }
 0x4d1   :  { %v664_v33 = vadd.f32 %v663_v25, %v662_v23 }
 0x4d3   :  { %670 = vst [vmem:[#allocation4] sm:$0x1] %v664_v33 }
 0x4d4   :  { %694 = dma.vmem_to_hbm [thread:$0]  %s690_s13, 16, %s692_s15, [#allocation5]  }
 0x4d5   :  { %1063 = dma.done.wait [#allocation3], 16  }
 0x4d6   :  { %1064 = vsyncadd [#allocation3], 4294967280 }
 0x4d7   :  { %1065 = dma.done.wait [#allocation5], 16  }
 0x4d8   :  { %1066 = vsyncadd [#allocation5], 4294967280 }
 0x4d9   :  { %705 = vsyncpa [#allocation3], 1 }
 0x4da   :  { %706 = vsyncpa [#allocation5], 1 }

</bundles_post_ra>
